<compile_context>
chip_gen: v7x
topology: tpu7x:2x2x1
jax: 0.10.0
libtpu: 0.0.40
codegen_flags: <defaults>
</compile_context>

<pallas_src>
import functools

import jax
import jax.numpy as jnp
from jax import lax
from jax.experimental import pallas as pl
from jax.experimental.pallas import tpu as pltpu

SUBLANE = 8
LANE = 128
_NEG = -1e30   # lane-mask value baked into the padded output bias


def _round_up(n, m):
    return (n + m - 1) // m * m


def rnn_seq_kernel(x_ref, h0_ref, wxh_ref, bh_ref, wo_ref, bo_ref,
                   out_ref, hfin_ref, xh_scratch, h_scratch, *, tchunk, ip_pad):
    c = pl.program_id(0)
    compute_dt = wxh_ref.dtype          # f32, or bf16 on v6e/v7x fast path

    # Hidden-state accumulator persists in VMEM scratch across all grid steps.
    @pl.when(c == 0)
    def _():
        h_scratch[...] = h0_ref[...]

    def step(s, h):
        # Assemble [x_t | h_t] in the fused-K scratch (both slices 128-aligned).
        xh_scratch[:, :ip_pad] = x_ref[s]
        xh_scratch[:, ip_pad:] = h

        # hidden = tanh(i2h(x) + h2h(h))  -- one fused dot, biases pre-folded.
        pre = jnp.dot(xh_scratch[...].astype(compute_dt), wxh_ref[...],
                      preferred_element_type=jnp.float32) + bh_ref[...]
        h_new = jnp.tanh(pre)

        # logits = h2o(hidden); padded lanes carry a -1e30 bias (mask baked in).
        logits = jnp.dot(h_new.astype(compute_dt), wo_ref[...],
                         preferred_element_type=jnp.float32) + bo_ref[...]

        # Flatten is a no-op for 2-D; LogSoftmax over lanes, max-shifted.
        m = jnp.max(logits, axis=1, keepdims=True)
        shifted = logits - m
        lse = jnp.log(jnp.sum(jnp.exp(shifted), axis=1, keepdims=True))
        out_ref[s] = (shifted - lse).astype(out_ref.dtype)
        return h_new

    h_last = lax.fori_loop(0, tchunk, step, h_scratch[...], unroll=True)
    h_scratch[...] = h_last

    @pl.when(c == pl.num_programs(0) - 1)
    def _():
        hfin_ref[...] = h_last.astype(hfin_ref.dtype)


def prepare_params(wi, bi, wh, bh, wo, bo, *, compute_dtype=jnp.float32):
    """One-time weight packing (call once, reuse across steps/sequences).

    wi: (I, H), wh: (H, H), wo: (H, O) -- already (in, out) layout.
    Biases may be (out,) or (1, out).
    compute_dtype: jnp.float32 (exact) or jnp.bfloat16 (v6e/v7x MXU fast path).
    """
    I, H = wi.shape
    O = wo.shape[1]
    Ip, Hp, Op = _round_up(I, LANE), _round_up(H, LANE), _round_up(O, LANE)
    f32 = jnp.float32

    # Fused recurrence weight: rows [0:I] <- W_i2h, rows [Ip:Ip+H] <- W_h2h.
    w_xh = jnp.zeros((Ip + Hp, Hp), compute_dtype)
    w_xh = w_xh.at[:I, :H].set(wi.astype(compute_dtype))
    w_xh = w_xh.at[Ip:Ip + H, :H].set(wh.astype(compute_dtype))

    b_h = jnp.zeros((1, Hp), f32).at[:, :H].set(
        (jnp.reshape(bi, (1, H)) + jnp.reshape(bh, (1, H))).astype(f32))

    w_o = jnp.zeros((Hp, Op), compute_dtype).at[:H, :O].set(
        wo.astype(compute_dtype))
    # Lane mask baked into the bias: padded output lanes get -1e30.
    b_o = jnp.full((1, Op), _NEG, f32).at[:, :O].set(
        jnp.reshape(bo, (1, O)).astype(f32))

    return {"w_xh": w_xh, "b_h": b_h, "w_o": w_o, "b_o": b_o,
            "dims": (I, H, O, Ip, Hp, Op)}


def rnn_forward_sequence(x_seq, h0, params, *, max_tchunk=8,
                         vmem_limit_bytes=32 * 1024 * 1024):
    """Run the RNN cell over a whole sequence inside one pallas_call.

    x_seq: (T, B, I); h0: (B, H); params from prepare_params.
    Returns (log_probs (T, B, O), h_T (B, H)).
    """
    T, B, I = x_seq.shape
    I_, H, O, Ip, Hp, Op = params["dims"]
    assert I == I_ and h0.shape == (B, H)
    Bp = _round_up(B, SUBLANE)

    # Largest chunk <= max_tchunk that divides T (grid is sequential in time).
    tchunk = max(d for d in range(1, min(T, max_tchunk) + 1) if T % d == 0)
    n_chunks = T // tchunk

    f32 = jnp.float32
    x_p = jnp.zeros((T, Bp, Ip), f32).at[:, :B, :I].set(x_seq.astype(f32))
    h0_p = jnp.zeros((Bp, Hp), f32).at[:B, :H].set(h0.astype(f32))

    resident = lambda c: (0, 0)          # same block every chunk -> stays in VMEM

    # Advisory cost hint: real (unpadded) work.
    flops = 2 * T * B * ((I + H) * H + H * O)
    transcendentals = T * B * (H + O)
    bytes_accessed = 4 * (T * B * I + B * H + (I + H) * H + H + H * O + O
                          + T * B * O + B * H)

    out_p, h_fin = pl.pallas_call(
        functools.partial(rnn_seq_kernel, tchunk=tchunk, ip_pad=Ip),
        out_shape=(jax.ShapeDtypeStruct((T, Bp, Op), f32),
                   jax.ShapeDtypeStruct((Bp, Hp), f32)),
        grid_spec=pltpu.PrefetchScalarGridSpec(
            num_scalar_prefetch=0,
            grid=(n_chunks,),
            in_specs=[
                pl.BlockSpec((tchunk, Bp, Ip), lambda c: (c, 0, 0)),  # x chunk
                pl.BlockSpec((Bp, Hp), resident),                     # h0
                pl.BlockSpec((Ip + Hp, Hp), resident),                # fused W
                pl.BlockSpec((1, Hp), resident),                      # b_i2h+b_h2h
                pl.BlockSpec((Hp, Op), resident),                     # W_h2o
                pl.BlockSpec((1, Op), resident),                      # b_h2o (+mask)
            ],
            out_specs=[
                pl.BlockSpec((tchunk, Bp, Op), lambda c: (c, 0, 0)),  # log-probs
                pl.BlockSpec((Bp, Hp), resident),                     # final hidden
            ],
            scratch_shapes=[
                pltpu.VMEM((Bp, Ip + Hp), jnp.float32),   # [x_t | h_t] fused-K
                pltpu.VMEM((Bp, Hp), jnp.float32),        # hidden accumulator
            ],
        ),
        compiler_params=pltpu.CompilerParams(
            dimension_semantics=("arbitrary",),       # time chunks are sequential
            vmem_limit_bytes=vmem_limit_bytes,        # cap lower (~48 MiB) on v7x
        ),
        cost_estimate=pl.CostEstimate(
            flops=flops, transcendentals=transcendentals,
            bytes_accessed=bytes_accessed),
    )(x_p, h0_p, params["w_xh"], params["b_h"], params["w_o"], params["b_o"])

    return out_p[:, :B, :O], h_fin[:B, :H]


def rnn_forward(x, h, params):
    """Single-step cell: exactly ModelRNN.forward(input, hidden)."""
    out_seq, h_new = rnn_forward_sequence(x[None], h, params)
    return out_seq[0], h_new


def init_linear_params(key, in_features, out_features):
    """Deterministic init mimicking nn.Linear (uniform +/- 1/sqrt(in))."""
    kw, kb = jax.random.split(key)
    bound = 1.0 / (in_features ** 0.5)
    # stored as (in, out): already transposed for x @ W
    w = jax.random.uniform(kw, (in_features, out_features), jnp.float32,
                           minval=-bound, maxval=bound)
    b = jax.random.uniform(kb, (out_features,), jnp.float32,
                           minval=-bound, maxval=bound)
    return w, b


if __name__ == "__main__":
    B, T, INPUT, HIDDEN, OUTPUT = 2, 8, 16, 32, 8

    key = jax.random.PRNGKey(0)
    k_x, k_h, k_i2h, k_h2h, k_h2o = jax.random.split(key, 5)

    x_seq = jax.random.normal(k_x, (T, B, INPUT), jnp.float32)
    hidden = jax.random.normal(k_h, (B, HIDDEN), jnp.float32)

    wi, bi = init_linear_params(k_i2h, INPUT, HIDDEN)
    wh, bh = init_linear_params(k_h2h, HIDDEN, HIDDEN)
    wo, bo = init_linear_params(k_h2o, HIDDEN, OUTPUT)

    # One-time weight packing (hoisted out of the per-call / per-step path).
    params = prepare_params(wi, bi, wh, bh, wo, bo)

    # Full sequence: one pallas_call, weights resident, time chunked in-kernel.
    out_seq, h_fin = rnn_forward_sequence(x_seq, hidden, params)
    jax.block_until_ready((out_seq, h_fin))

    # Single-step call matching ModelRNN.forward(input, hidden).
    out_step, h_step = rnn_forward(x_seq[0], hidden, params)
    jax.block_until_ready((out_step, h_step))

    # Pure-JAX step-by-step reference (matches the PyTorch module).
    def ref_step(h, x):
        h_new = jnp.tanh(x @ wi + bi + h @ wh + bh)
        logits = h_new @ wo + bo
        return h_new, jax.nn.log_softmax(logits, axis=1)

    h_ref = hidden
    ref_outs = []
    for t in range(T):
        h_ref, o = ref_step(h_ref, x_seq[t])
        ref_outs.append(o)
    ref_outs = jnp.stack(ref_outs)

    assert jnp.allclose(out_seq, ref_outs, atol=1e-5, rtol=1e-5)
    assert jnp.allclose(h_fin, h_ref, atol=1e-5, rtol=1e-5)
    assert jnp.allclose(out_step, ref_outs[0], atol=1e-5, rtol=1e-5)
    assert jnp.allclose(h_step, jnp.tanh(x_seq[0] @ wi + bi + hidden @ wh + bh),
                        atol=1e-5, rtol=1e-5)

    # Optional v6e/v7x fast path: bf16 MXU operands, f32 accumulation/activations.
    params_bf16 = prepare_params(wi, bi, wh, bh, wo, bo,
                                 compute_dtype=jnp.bfloat16)
    out_b, h_b = rnn_forward_sequence(x_seq, hidden, params_bf16)
    jax.block_until_ready((out_b, h_b))
    assert float(jnp.max(jnp.abs(out_b - ref_outs))) < 0.15
    assert float(jnp.max(jnp.abs(h_b - h_ref))) < 0.15

    print("KERNEL_OK")
</pallas_src>

<mosaic_0001>
module attributes {stable_mosaic.version = 11 : i64} {
  func.func @rnn_seq_kernel(%arg0: i32, %arg1: memref<8x8x128xf32, #tpu.memory_space<vmem>>, %arg2: memref<8x128xf32, #tpu.memory_space<vmem>>, %arg3: memref<256x128xf32, #tpu.memory_space<vmem>>, %arg4: memref<1x128xf32, #tpu.memory_space<vmem>>, %arg5: memref<128x128xf32, #tpu.memory_space<vmem>>, %arg6: memref<1x128xf32, #tpu.memory_space<vmem>>, %arg7: memref<8x8x128xf32, #tpu.memory_space<vmem>>, %arg8: memref<8x128xf32, #tpu.memory_space<vmem>>, %arg9: memref<8x256xf32, #tpu.memory_space<vmem>>, %arg10: memref<8x128xf32, #tpu.memory_space<vmem>>) attributes {dimension_semantics = [#tpu.dimension_semantics<arbitrary>], iteration_bounds = array<i64: 1>, scalar_prefetch = 0 : i64, scratch_operands = 2 : i64, tpu.core_type = #tpu.core_type<tc>, window_params = [{transform_indices = @transform_0, window_bounds = array<i64: 8, 8, 128>}, {pipeline_mode = #tpu.pipeline_mode<synchronous>, transform_indices = @transform_1, window_bounds = array<i64: 8, 128>}, {pipeline_mode = #tpu.pipeline_mode<synchronous>, transform_indices = @transform_2, window_bounds = array<i64: 256, 128>}, {pipeline_mode = #tpu.pipeline_mode<synchronous>, transform_indices = @transform_3, window_bounds = array<i64: 1, 128>}, {pipeline_mode = #tpu.pipeline_mode<synchronous>, transform_indices = @transform_4, window_bounds = array<i64: 128, 128>}, {pipeline_mode = #tpu.pipeline_mode<synchronous>, transform_indices = @transform_5, window_bounds = array<i64: 1, 128>}, {transform_indices = @transform_6, window_bounds = array<i64: 8, 8, 128>}, {pipeline_mode = #tpu.pipeline_mode<synchronous>, transform_indices = @transform_7, window_bounds = array<i64: 8, 128>}]} {
    %c0_i32 = arith.constant 0 : i32
    %0 = arith.cmpi eq, %arg0, %c0_i32 : i32
    %1 = arith.extui %0 : i1 to i32
    %c0_i32_0 = arith.constant 0 : i32
    %2 = arith.cmpi ne, %1, %c0_i32_0 : i32
    scf.if %2 {
      %c0_181 = arith.constant 0 : index
      %c0_182 = arith.constant 0 : index
      %256 = vector.load %arg2[%c0_181, %c0_182] : memref<8x128xf32, #tpu.memory_space<vmem>>, vector<8x128xf32>
      %c0_183 = arith.constant 0 : index
      %c0_184 = arith.constant 0 : index
      %257 = vector.load %arg10[%c0_183, %c0_184] : memref<8x128xf32, #tpu.memory_space<vmem>>, vector<8x128xf32>
      tpu.vector_store %arg10[%c0_183, %c0_184], %256 {strides = array<i32>} : memref<8x128xf32, #tpu.memory_space<vmem>>, vector<8x128xf32>,
    } else {
    }
    %c0 = arith.constant 0 : index
    %c0_1 = arith.constant 0 : index
    %3 = vector.load %arg10[%c0, %c0_1] : memref<8x128xf32, #tpu.memory_space<vmem>>, vector<8x128xf32>
    %c0_i32_2 = arith.constant 0 : i32
    %4 = arith.index_cast %c0_i32_2 : i32 to index
    %c0_3 = arith.constant 0 : index
    %c0_4 = arith.constant 0 : index
    %5 = vector.load %arg1[%4, %c0_3, %c0_4] : memref<8x8x128xf32, #tpu.memory_space<vmem>>, vector<1x8x128xf32>
    %6 = vector.shape_cast %5 : vector<1x8x128xf32> to vector<8x128xf32>
    %c0_5 = arith.constant 0 : index
    %c0_6 = arith.constant 0 : index
    %7 = vector.load %arg9[%c0_5, %c0_6] : memref<8x256xf32, #tpu.memory_space<vmem>>, vector<8x128xf32>
    tpu.vector_store %arg9[%c0_5, %c0_6], %6 {strides = array<i32>} : memref<8x256xf32, #tpu.memory_space<vmem>>, vector<8x128xf32>,
    %c0_7 = arith.constant 0 : index
    %c128 = arith.constant 128 : index
    %8 = vector.load %arg9[%c0_7, %c128] : memref<8x256xf32, #tpu.memory_space<vmem>>, vector<8x128xf32>
    tpu.vector_store %arg9[%c0_7, %c128], %3 {strides = array<i32>} : memref<8x256xf32, #tpu.memory_space<vmem>>, vector<8x128xf32>,
    %c0_8 = arith.constant 0 : index
    %c0_9 = arith.constant 0 : index
    %9 = vector.load %arg9[%c0_8, %c0_9] : memref<8x256xf32, #tpu.memory_space<vmem>>, vector<8x256xf32>
    %c0_10 = arith.constant 0 : index
    %c0_11 = arith.constant 0 : index
    %10 = vector.load %arg3[%c0_10, %c0_11] : memref<256x128xf32, #tpu.memory_space<vmem>>, vector<256x128xf32>
    %cst = arith.constant dense<0.000000e+00> : vector<8x128xf32>
    %11 = tpu.matmul %9, %10, %cst {dimension_numbers = #tpu.dot_dimension_numbers<[1], [0], [0], [1], [0, 0, 1, 1], [], []>} : vector<8x256xf32>, vector<256x128xf32>, vector<8x128xf32> -> vector<8x128xf32>
    %c0_12 = arith.constant 0 : index
    %c0_13 = arith.constant 0 : index
    %12 = vector.load %arg4[%c0_12, %c0_13] : memref<1x128xf32, #tpu.memory_space<vmem>>, vector<1x128xf32>
    %13 = vector.broadcast %12 : vector<1x128xf32> to vector<8x128xf32>
    %14 = arith.addf %11, %13 : vector<8x128xf32>
    %15 = math.tanh %14 : vector<8x128xf32>
    %c0_14 = arith.constant 0 : index
    %c0_15 = arith.constant 0 : index
    %16 = vector.load %arg5[%c0_14, %c0_15] : memref<128x128xf32, #tpu.memory_space<vmem>>, vector<128x128xf32>
    %cst_16 = arith.constant dense<0.000000e+00> : vector<8x128xf32>
    %17 = tpu.matmul %15, %16, %cst_16 {dimension_numbers = #tpu.dot_dimension_numbers<[1], [0], [0], [1], [0, 0, 1, 1], [], []>} : vector<8x128xf32>, vector<128x128xf32>, vector<8x128xf32> -> vector<8x128xf32>
    %c0_17 = arith.constant 0 : index
    %c0_18 = arith.constant 0 : index
    %18 = vector.load %arg6[%c0_17, %c0_18] : memref<1x128xf32, #tpu.memory_space<vmem>>, vector<1x128xf32>
    %19 = vector.broadcast %18 : vector<1x128xf32> to vector<8x128xf32>
    %20 = arith.addf %17, %19 : vector<8x128xf32>
    %cst_19 = arith.constant dense<0xFF800000> : vector<8xf32>
    %21 = vector.multi_reduction <maximumf>, %20, %cst_19 [1] : vector<8x128xf32> to vector<8xf32>
    %22 = vector.shape_cast %21 : vector<8xf32> to vector<8x1xf32>
    %23 = vector.broadcast %22 : vector<8x1xf32> to vector<8x128xf32>
    %24 = arith.subf %20, %23 : vector<8x128xf32>
    %25 = math.exp %24 : vector<8x128xf32>
    %cst_20 = arith.constant dense<0.000000e+00> : vector<8xf32>
    %26 = vector.multi_reduction <add>, %25, %cst_20 [1] : vector<8x128xf32> to vector<8xf32>
    %27 = vector.shape_cast %26 : vector<8xf32> to vector<8x1xf32>
    %28 = math.log %27 : vector<8x1xf32>
    %29 = vector.broadcast %28 : vector<8x1xf32> to vector<8x128xf32>
    %30 = arith.subf %24, %29 : vector<8x128xf32>
    %31 = arith.index_cast %c0_i32_2 : i32 to index
    %c0_21 = arith.constant 0 : index
    %c0_22 = arith.constant 0 : index
    %32 = vector.load %arg7[%31, %c0_21, %c0_22] : memref<8x8x128xf32, #tpu.memory_space<vmem>>, vector<1x8x128xf32>
    %33 = vector.shape_cast %32 : vector<1x8x128xf32> to vector<8x128xf32>
    %34 = vector.shape_cast %30 : vector<8x128xf32> to vector<1x8x128xf32>
    tpu.vector_store %arg7[%31, %c0_21, %c0_22], %34 {strides = array<i32>} : memref<8x8x128xf32, #tpu.memory_space<vmem>>, vector<1x8x128xf32>,
    %c1_i32 = arith.constant 1 : i32
    %35 = arith.index_cast %c1_i32 : i32 to index
    %c0_23 = arith.constant 0 : index
    %c0_24 = arith.constant 0 : index
    %36 = vector.load %arg1[%35, %c0_23, %c0_24] : memref<8x8x128xf32, #tpu.memory_space<vmem>>, vector<1x8x128xf32>
    %37 = vector.shape_cast %36 : vector<1x8x128xf32> to vector<8x128xf32>
    %c0_25 = arith.constant 0 : index
    %c0_26 = arith.constant 0 : index
    %38 = vector.load %arg9[%c0_25, %c0_26] : memref<8x256xf32, #tpu.memory_space<vmem>>, vector<8x128xf32>
    tpu.vector_store %arg9[%c0_25, %c0_26], %37 {strides = array<i32>} : memref<8x256xf32, #tpu.memory_space<vmem>>, vector<8x128xf32>,
    %c0_27 = arith.constant 0 : index
    %c128_28 = arith.constant 128 : index
    %39 = vector.load %arg9[%c0_27, %c128_28] : memref<8x256xf32, #tpu.memory_space<vmem>>, vector<8x128xf32>
    tpu.vector_store %arg9[%c0_27, %c128_28], %15 {strides = array<i32>} : memref<8x256xf32, #tpu.memory_space<vmem>>, vector<8x128xf32>,
    %c0_29 = arith.constant 0 : index
    %c0_30 = arith.constant 0 : index
    %40 = vector.load %arg9[%c0_29, %c0_30] : memref<8x256xf32, #tpu.memory_space<vmem>>, vector<8x256xf32>
    %c0_31 = arith.constant 0 : index
    %c0_32 = arith.constant 0 : index
    %41 = vector.load %arg3[%c0_31, %c0_32] : memref<256x128xf32, #tpu.memory_space<vmem>>, vector<256x128xf32>
    %cst_33 = arith.constant dense<0.000000e+00> : vector<8x128xf32>
    %42 = tpu.matmul %40, %41, %cst_33 {dimension_numbers = #tpu.dot_dimension_numbers<[1], [0], [0], [1], [0, 0, 1, 1], [], []>} : vector<8x256xf32>, vector<256x128xf32>, vector<8x128xf32> -> vector<8x128xf32>
    %c0_34 = arith.constant 0 : index
    %c0_35 = arith.constant 0 : index
    %43 = vector.load %arg4[%c0_34, %c0_35] : memref<1x128xf32, #tpu.memory_space<vmem>>, vector<1x128xf32>
    %44 = vector.broadcast %43 : vector<1x128xf32> to vector<8x128xf32>
    %45 = arith.addf %42, %44 : vector<8x128xf32>
    %46 = math.tanh %45 : vector<8x128xf32>
    %c0_36 = arith.constant 0 : index
    %c0_37 = arith.constant 0 : index
    %47 = vector.load %arg5[%c0_36, %c0_37] : memref<128x128xf32, #tpu.memory_space<vmem>>, vector<128x128xf32>
    %cst_38 = arith.constant dense<0.000000e+00> : vector<8x128xf32>
    %48 = tpu.matmul %46, %47, %cst_38 {dimension_numbers = #tpu.dot_dimension_numbers<[1], [0], [0], [1], [0, 0, 1, 1], [], []>} : vector<8x128xf32>, vector<128x128xf32>, vector<8x128xf32> -> vector<8x128xf32>
    %c0_39 = arith.constant 0 : index
    %c0_40 = arith.constant 0 : index
    %49 = vector.load %arg6[%c0_39, %c0_40] : memref<1x128xf32, #tpu.memory_space<vmem>>, vector<1x128xf32>
    %50 = vector.broadcast %49 : vector<1x128xf32> to vector<8x128xf32>
    %51 = arith.addf %48, %50 : vector<8x128xf32>
    %cst_41 = arith.constant dense<0xFF800000> : vector<8xf32>
    %52 = vector.multi_reduction <maximumf>, %51, %cst_41 [1] : vector<8x128xf32> to vector<8xf32>
    %53 = vector.shape_cast %52 : vector<8xf32> to vector<8x1xf32>
    %54 = vector.broadcast %53 : vector<8x1xf32> to vector<8x128xf32>
    %55 = arith.subf %51, %54 : vector<8x128xf32>
    %56 = math.exp %55 : vector<8x128xf32>
    %cst_42 = arith.constant dense<0.000000e+00> : vector<8xf32>
    %57 = vector.multi_reduction <add>, %56, %cst_42 [1] : vector<8x128xf32> to vector<8xf32>
    %58 = vector.shape_cast %57 : vector<8xf32> to vector<8x1xf32>
    %59 = math.log %58 : vector<8x1xf32>
    %60 = vector.broadcast %59 : vector<8x1xf32> to vector<8x128xf32>
    %61 = arith.subf %55, %60 : vector<8x128xf32>
    %62 = arith.index_cast %c1_i32 : i32 to index
    %c0_43 = arith.constant 0 : index
    %c0_44 = arith.constant 0 : index
    %63 = vector.load %arg7[%62, %c0_43, %c0_44] : memref<8x8x128xf32, #tpu.memory_space<vmem>>, vector<1x8x128xf32>
    %64 = vector.shape_cast %63 : vector<1x8x128xf32> to vector<8x128xf32>
    %65 = vector.shape_cast %61 : vector<8x128xf32> to vector<1x8x128xf32>
    tpu.vector_store %arg7[%62, %c0_43, %c0_44], %65 {strides = array<i32>} : memref<8x8x128xf32, #tpu.memory_space<vmem>>, vector<1x8x128xf32>,
    %c2_i32 = arith.constant 2 : i32
    %66 = arith.index_cast %c2_i32 : i32 to index
    %c0_45 = arith.constant 0 : index
    %c0_46 = arith.constant 0 : index
    %67 = vector.load %arg1[%66, %c0_45, %c0_46] : memref<8x8x128xf32, #tpu.memory_space<vmem>>, vector<1x8x128xf32>
    %68 = vector.shape_cast %67 : vector<1x8x128xf32> to vector<8x128xf32>
    %c0_47 = arith.constant 0 : index
    %c0_48 = arith.constant 0 : index
    %69 = vector.load %arg9[%c0_47, %c0_48] : memref<8x256xf32, #tpu.memory_space<vmem>>, vector<8x128xf32>
    tpu.vector_store %arg9[%c0_47, %c0_48], %68 {strides = array<i32>} : memref<8x256xf32, #tpu.memory_space<vmem>>, vector<8x128xf32>,
    %c0_49 = arith.constant 0 : index
    %c128_50 = arith.constant 128 : index
    %70 = vector.load %arg9[%c0_49, %c128_50] : memref<8x256xf32, #tpu.memory_space<vmem>>, vector<8x128xf32>
    tpu.vector_store %arg9[%c0_49, %c128_50], %46 {strides = array<i32>} : memref<8x256xf32, #tpu.memory_space<vmem>>, vector<8x128xf32>,
    %c0_51 = arith.constant 0 : index
    %c0_52 = arith.constant 0 : index
    %71 = vector.load %arg9[%c0_51, %c0_52] : memref<8x256xf32, #tpu.memory_space<vmem>>, vector<8x256xf32>
    %c0_53 = arith.constant 0 : index
    %c0_54 = arith.constant 0 : index
    %72 = vector.load %arg3[%c0_53, %c0_54] : memref<256x128xf32, #tpu.memory_space<vmem>>, vector<256x128xf32>
    %cst_55 = arith.constant dense<0.000000e+00> : vector<8x128xf32>
    %73 = tpu.matmul %71, %72, %cst_55 {dimension_numbers = #tpu.dot_dimension_numbers<[1], [0], [0], [1], [0, 0, 1, 1], [], []>} : vector<8x256xf32>, vector<256x128xf32>, vector<8x128xf32> -> vector<8x128xf32>
    %c0_56 = arith.constant 0 : index
    %c0_57 = arith.constant 0 : index
    %74 = vector.load %arg4[%c0_56, %c0_57] : memref<1x128xf32, #tpu.memory_space<vmem>>, vector<1x128xf32>
    %75 = vector.broadcast %74 : vector<1x128xf32> to vector<8x128xf32>
    %76 = arith.addf %73, %75 : vector<8x128xf32>
    %77 = math.tanh %76 : vector<8x128xf32>
    %c0_58 = arith.constant 0 : index
    %c0_59 = arith.constant 0 : index
    %78 = vector.load %arg5[%c0_58, %c0_59] : memref<128x128xf32, #tpu.memory_space<vmem>>, vector<128x128xf32>
    %cst_60 = arith.constant dense<0.000000e+00> : vector<8x128xf32>
    %79 = tpu.matmul %77, %78, %cst_60 {dimension_numbers = #tpu.dot_dimension_numbers<[1], [0], [0], [1], [0, 0, 1, 1], [], []>} : vector<8x128xf32>, vector<128x128xf32>, vector<8x128xf32> -> vector<8x128xf32>
    %c0_61 = arith.constant 0 : index
    %c0_62 = arith.constant 0 : index
    %80 = vector.load %arg6[%c0_61, %c0_62] : memref<1x128xf32, #tpu.memory_space<vmem>>, vector<1x128xf32>
    %81 = vector.broadcast %80 : vector<1x128xf32> to vector<8x128xf32>
    %82 = arith.addf %79, %81 : vector<8x128xf32>
    %cst_63 = arith.constant dense<0xFF800000> : vector<8xf32>
    %83 = vector.multi_reduction <maximumf>, %82, %cst_63 [1] : vector<8x128xf32> to vector<8xf32>
    %84 = vector.shape_cast %83 : vector<8xf32> to vector<8x1xf32>
    %85 = vector.broadcast %84 : vector<8x1xf32> to vector<8x128xf32>
    %86 = arith.subf %82, %85 : vector<8x128xf32>
    %87 = math.exp %86 : vector<8x128xf32>
    %cst_64 = arith.constant dense<0.000000e+00> : vector<8xf32>
    %88 = vector.multi_reduction <add>, %87, %cst_64 [1] : vector<8x128xf32> to vector<8xf32>
    %89 = vector.shape_cast %88 : vector<8xf32> to vector<8x1xf32>
    %90 = math.log %89 : vector<8x1xf32>
    %91 = vector.broadcast %90 : vector<8x1xf32> to vector<8x128xf32>
    %92 = arith.subf %86, %91 : vector<8x128xf32>
    %93 = arith.index_cast %c2_i32 : i32 to index
    %c0_65 = arith.constant 0 : index
    %c0_66 = arith.constant 0 : index
    %94 = vector.load %arg7[%93, %c0_65, %c0_66] : memref<8x8x128xf32, #tpu.memory_space<vmem>>, vector<1x8x128xf32>
    %95 = vector.shape_cast %94 : vector<1x8x128xf32> to vector<8x128xf32>
    %96 = vector.shape_cast %92 : vector<8x128xf32> to vector<1x8x128xf32>
    tpu.vector_store %arg7[%93, %c0_65, %c0_66], %96 {strides = array<i32>} : memref<8x8x128xf32, #tpu.memory_space<vmem>>, vector<1x8x128xf32>,
    %c3_i32 = arith.constant 3 : i32
    %97 = arith.index_cast %c3_i32 : i32 to index
    %c0_67 = arith.constant 0 : index
    %c0_68 = arith.constant 0 : index
    %98 = vector.load %arg1[%97, %c0_67, %c0_68] : memref<8x8x128xf32, #tpu.memory_space<vmem>>, vector<1x8x128xf32>
    %99 = vector.shape_cast %98 : vector<1x8x128xf32> to vector<8x128xf32>
    %c0_69 = arith.constant 0 : index
    %c0_70 = arith.constant 0 : index
    %100 = vector.load %arg9[%c0_69, %c0_70] : memref<8x256xf32, #tpu.memory_space<vmem>>, vector<8x128xf32>
    tpu.vector_store %arg9[%c0_69, %c0_70], %99 {strides = array<i32>} : memref<8x256xf32, #tpu.memory_space<vmem>>, vector<8x128xf32>,
    %c0_71 = arith.constant 0 : index
    %c128_72 = arith.constant 128 : index
    %101 = vector.load %arg9[%c0_71, %c128_72] : memref<8x256xf32, #tpu.memory_space<vmem>>, vector<8x128xf32>
    tpu.vector_store %arg9[%c0_71, %c128_72], %77 {strides = array<i32>} : memref<8x256xf32, #tpu.memory_space<vmem>>, vector<8x128xf32>,
    %c0_73 = arith.constant 0 : index
    %c0_74 = arith.constant 0 : index
    %102 = vector.load %arg9[%c0_73, %c0_74] : memref<8x256xf32, #tpu.memory_space<vmem>>, vector<8x256xf32>
    %c0_75 = arith.constant 0 : index
    %c0_76 = arith.constant 0 : index
    %103 = vector.load %arg3[%c0_75, %c0_76] : memref<256x128xf32, #tpu.memory_space<vmem>>, vector<256x128xf32>
    %cst_77 = arith.constant dense<0.000000e+00> : vector<8x128xf32>
    %104 = tpu.matmul %102, %103, %cst_77 {dimension_numbers = #tpu.dot_dimension_numbers<[1], [0], [0], [1], [0, 0, 1, 1], [], []>} : vector<8x256xf32>, vector<256x128xf32>, vector<8x128xf32> -> vector<8x128xf32>
    %c0_78 = arith.constant 0 : index
    %c0_79 = arith.constant 0 : index
    %105 = vector.load %arg4[%c0_78, %c0_79] : memref<1x128xf32, #tpu.memory_space<vmem>>, vector<1x128xf32>
    %106 = vector.broadcast %105 : vector<1x128xf32> to vector<8x128xf32>
    %107 = arith.addf %104, %106 : vector<8x128xf32>
    %108 = math.tanh %107 : vector<8x128xf32>
    %c0_80 = arith.constant 0 : index
    %c0_81 = arith.constant 0 : index
    %109 = vector.load %arg5[%c0_80, %c0_81] : memref<128x128xf32, #tpu.memory_space<vmem>>, vector<128x128xf32>
    %cst_82 = arith.constant dense<0.000000e+00> : vector<8x128xf32>
    %110 = tpu.matmul %108, %109, %cst_82 {dimension_numbers = #tpu.dot_dimension_numbers<[1], [0], [0], [1], [0, 0, 1, 1], [], []>} : vector<8x128xf32>, vector<128x128xf32>, vector<8x128xf32> -> vector<8x128xf32>
    %c0_83 = arith.constant 0 : index
    %c0_84 = arith.constant 0 : index
    %111 = vector.load %arg6[%c0_83, %c0_84] : memref<1x128xf32, #tpu.memory_space<vmem>>, vector<1x128xf32>
    %112 = vector.broadcast %111 : vector<1x128xf32> to vector<8x128xf32>
    %113 = arith.addf %110, %112 : vector<8x128xf32>
    %cst_85 = arith.constant dense<0xFF800000> : vector<8xf32>
    %114 = vector.multi_reduction <maximumf>, %113, %cst_85 [1] : vector<8x128xf32> to vector<8xf32>
    %115 = vector.shape_cast %114 : vector<8xf32> to vector<8x1xf32>
    %116 = vector.broadcast %115 : vector<8x1xf32> to vector<8x128xf32>
    %117 = arith.subf %113, %116 : vector<8x128xf32>
    %118 = math.exp %117 : vector<8x128xf32>
    %cst_86 = arith.constant dense<0.000000e+00> : vector<8xf32>
    %119 = vector.multi_reduction <add>, %118, %cst_86 [1] : vector<8x128xf32> to vector<8xf32>
    %120 = vector.shape_cast %119 : vector<8xf32> to vector<8x1xf32>
    %121 = math.log %120 : vector<8x1xf32>
    %122 = vector.broadcast %121 : vector<8x1xf32> to vector<8x128xf32>
    %123 = arith.subf %117, %122 : vector<8x128xf32>
    %124 = arith.index_cast %c3_i32 : i32 to index
    %c0_87 = arith.constant 0 : index
    %c0_88 = arith.constant 0 : index
    %125 = vector.load %arg7[%124, %c0_87, %c0_88] : memref<8x8x128xf32, #tpu.memory_space<vmem>>, vector<1x8x128xf32>
    %126 = vector.shape_cast %125 : vector<1x8x128xf32> to vector<8x128xf32>
    %127 = vector.shape_cast %123 : vector<8x128xf32> to vector<1x8x128xf32>
    tpu.vector_store %arg7[%124, %c0_87, %c0_88], %127 {strides = array<i32>} : memref<8x8x128xf32, #tpu.memory_space<vmem>>, vector<1x8x128xf32>,
    %c4_i32 = arith.constant 4 : i32
    %128 = arith.index_cast %c4_i32 : i32 to index
    %c0_89 = arith.constant 0 : index
    %c0_90 = arith.constant 0 : index
    %129 = vector.load %arg1[%128, %c0_89, %c0_90] : memref<8x8x128xf32, #tpu.memory_space<vmem>>, vector<1x8x128xf32>
    %130 = vector.shape_cast %129 : vector<1x8x128xf32> to vector<8x128xf32>
    %c0_91 = arith.constant 0 : index
    %c0_92 = arith.constant 0 : index
    %131 = vector.load %arg9[%c0_91, %c0_92] : memref<8x256xf32, #tpu.memory_space<vmem>>, vector<8x128xf32>
    tpu.vector_store %arg9[%c0_91, %c0_92], %130 {strides = array<i32>} : memref<8x256xf32, #tpu.memory_space<vmem>>, vector<8x128xf32>,
    %c0_93 = arith.constant 0 : index
    %c128_94 = arith.constant 128 : index
    %132 = vector.load %arg9[%c0_93, %c128_94] : memref<8x256xf32, #tpu.memory_space<vmem>>, vector<8x128xf32>
    tpu.vector_store %arg9[%c0_93, %c128_94], %108 {strides = array<i32>} : memref<8x256xf32, #tpu.memory_space<vmem>>, vector<8x128xf32>,
    %c0_95 = arith.constant 0 : index
    %c0_96 = arith.constant 0 : index
    %133 = vector.load %arg9[%c0_95, %c0_96] : memref<8x256xf32, #tpu.memory_space<vmem>>, vector<8x256xf32>
    %c0_97 = arith.constant 0 : index
    %c0_98 = arith.constant 0 : index
    %134 = vector.load %arg3[%c0_97, %c0_98] : memref<256x128xf32, #tpu.memory_space<vmem>>, vector<256x128xf32>
    %cst_99 = arith.constant dense<0.000000e+00> : vector<8x128xf32>
    %135 = tpu.matmul %133, %134, %cst_99 {dimension_numbers = #tpu.dot_dimension_numbers<[1], [0], [0], [1], [0, 0, 1, 1], [], []>} : vector<8x256xf32>, vector<256x128xf32>, vector<8x128xf32> -> vector<8x128xf32>
    %c0_100 = arith.constant 0 : index
    %c0_101 = arith.constant 0 : index
    %136 = vector.load %arg4[%c0_100, %c0_101] : memref<1x128xf32, #tpu.memory_space<vmem>>, vector<1x128xf32>
    %137 = vector.broadcast %136 : vector<1x128xf32> to vector<8x128xf32>
    %138 = arith.addf %135, %137 : vector<8x128xf32>
    %139 = math.tanh %138 : vector<8x128xf32>
    %c0_102 = arith.constant 0 : index
    %c0_103 = arith.constant 0 : index
    %140 = vector.load %arg5[%c0_102, %c0_103] : memref<128x128xf32, #tpu.memory_space<vmem>>, vector<128x128xf32>
    %cst_104 = arith.constant dense<0.000000e+00> : vector<8x128xf32>
    %141 = tpu.matmul %139, %140, %cst_104 {dimension_numbers = #tpu.dot_dimension_numbers<[1], [0], [0], [1], [0, 0, 1, 1], [], []>} : vector<8x128xf32>, vector<128x128xf32>, vector<8x128xf32> -> vector<8x128xf32>
    %c0_105 = arith.constant 0 : index
    %c0_106 = arith.constant 0 : index
    %142 = vector.load %arg6[%c0_105, %c0_106] : memref<1x128xf32, #tpu.memory_space<vmem>>, vector<1x128xf32>
    %143 = vector.broadcast %142 : vector<1x128xf32> to vector<8x128xf32>
    %144 = arith.addf %141, %143 : vector<8x128xf32>
    %cst_107 = arith.constant dense<0xFF800000> : vector<8xf32>
    %145 = vector.multi_reduction <maximumf>, %144, %cst_107 [1] : vector<8x128xf32> to vector<8xf32>
    %146 = vector.shape_cast %145 : vector<8xf32> to vector<8x1xf32>
    %147 = vector.broadcast %146 : vector<8x1xf32> to vector<8x128xf32>
    %148 = arith.subf %144, %147 : vector<8x128xf32>
    %149 = math.exp %148 : vector<8x128xf32>
    %cst_108 = arith.constant dense<0.000000e+00> : vector<8xf32>
    %150 = vector.multi_reduction <add>, %149, %cst_108 [1] : vector<8x128xf32> to vector<8xf32>
    %151 = vector.shape_cast %150 : vector<8xf32> to vector<8x1xf32>
    %152 = math.log %151 : vector<8x1xf32>
    %153 = vector.broadcast %152 : vector<8x1xf32> to vector<8x128xf32>
    %154 = arith.subf %148, %153 : vector<8x128xf32>
    %155 = arith.index_cast %c4_i32 : i32 to index
    %c0_109 = arith.constant 0 : index
    %c0_110 = arith.constant 0 : index
    %156 = vector.load %arg7[%155, %c0_109, %c0_110] : memref<8x8x128xf32, #tpu.memory_space<vmem>>, vector<1x8x128xf32>
    %157 = vector.shape_cast %156 : vector<1x8x128xf32> to vector<8x128xf32>
    %158 = vector.shape_cast %154 : vector<8x128xf32> to vector<1x8x128xf32>
    tpu.vector_store %arg7[%155, %c0_109, %c0_110], %158 {strides = array<i32>} : memref<8x8x128xf32, #tpu.memory_space<vmem>>, vector<1x8x128xf32>,
    %c5_i32 = arith.constant 5 : i32
    %159 = arith.index_cast %c5_i32 : i32 to index
    %c0_111 = arith.constant 0 : index
    %c0_112 = arith.constant 0 : index
    %160 = vector.load %arg1[%159, %c0_111, %c0_112] : memref<8x8x128xf32, #tpu.memory_space<vmem>>, vector<1x8x128xf32>
    %161 = vector.shape_cast %160 : vector<1x8x128xf32> to vector<8x128xf32>
    %c0_113 = arith.constant 0 : index
    %c0_114 = arith.constant 0 : index
    %162 = vector.load %arg9[%c0_113, %c0_114] : memref<8x256xf32, #tpu.memory_space<vmem>>, vector<8x128xf32>
    tpu.vector_store %arg9[%c0_113, %c0_114], %161 {strides = array<i32>} : memref<8x256xf32, #tpu.memory_space<vmem>>, vector<8x128xf32>,
    %c0_115 = arith.constant 0 : index
    %c128_116 = arith.constant 128 : index
    %163 = vector.load %arg9[%c0_115, %c128_116] : memref<8x256xf32, #tpu.memory_space<vmem>>, vector<8x128xf32>
    tpu.vector_store %arg9[%c0_115, %c128_116], %139 {strides = array<i32>} : memref<8x256xf32, #tpu.memory_space<vmem>>, vector<8x128xf32>,
    %c0_117 = arith.constant 0 : index
    %c0_118 = arith.constant 0 : index
    %164 = vector.load %arg9[%c0_117, %c0_118] : memref<8x256xf32, #tpu.memory_space<vmem>>, vector<8x256xf32>
    %c0_119 = arith.constant 0 : index
    %c0_120 = arith.constant 0 : index
    %165 = vector.load %arg3[%c0_119, %c0_120] : memref<256x128xf32, #tpu.memory_space<vmem>>, vector<256x128xf32>
    %cst_121 = arith.constant dense<0.000000e+00> : vector<8x128xf32>
    %166 = tpu.matmul %164, %165, %cst_121 {dimension_numbers = #tpu.dot_dimension_numbers<[1], [0], [0], [1], [0, 0, 1, 1], [], []>} : vector<8x256xf32>, vector<256x128xf32>, vector<8x128xf32> -> vector<8x128xf32>
    %c0_122 = arith.constant 0 : index
    %c0_123 = arith.constant 0 : index
    %167 = vector.load %arg4[%c0_122, %c0_123] : memref<1x128xf32, #tpu.memory_space<vmem>>, vector<1x128xf32>
    %168 = vector.broadcast %167 : vector<1x128xf32> to vector<8x128xf32>
    %169 = arith.addf %166, %168 : vector<8x128xf32>
    %170 = math.tanh %169 : vector<8x128xf32>
    %c0_124 = arith.constant 0 : index
    %c0_125 = arith.constant 0 : index
    %171 = vector.load %arg5[%c0_124, %c0_125] : memref<128x128xf32, #tpu.memory_space<vmem>>, vector<128x128xf32>
    %cst_126 = arith.constant dense<0.000000e+00> : vector<8x128xf32>
    %172 = tpu.matmul %170, %171, %cst_126 {dimension_numbers = #tpu.dot_dimension_numbers<[1], [0], [0], [1], [0, 0, 1, 1], [], []>} : vector<8x128xf32>, vector<128x128xf32>, vector<8x128xf32> -> vector<8x128xf32>
    %c0_127 = arith.constant 0 : index
    %c0_128 = arith.constant 0 : index
    %173 = vector.load %arg6[%c0_127, %c0_128] : memref<1x128xf32, #tpu.memory_space<vmem>>, vector<1x128xf32>
    %174 = vector.broadcast %173 : vector<1x128xf32> to vector<8x128xf32>
    %175 = arith.addf %172, %174 : vector<8x128xf32>
    %cst_129 = arith.constant dense<0xFF800000> : vector<8xf32>
    %176 = vector.multi_reduction <maximumf>, %175, %cst_129 [1] : vector<8x128xf32> to vector<8xf32>
    %177 = vector.shape_cast %176 : vector<8xf32> to vector<8x1xf32>
    %178 = vector.broadcast %177 : vector<8x1xf32> to vector<8x128xf32>
    %179 = arith.subf %175, %178 : vector<8x128xf32>
    %180 = math.exp %179 : vector<8x128xf32>
    %cst_130 = arith.constant dense<0.000000e+00> : vector<8xf32>
    %181 = vector.multi_reduction <add>, %180, %cst_130 [1] : vector<8x128xf32> to vector<8xf32>
    %182 = vector.shape_cast %181 : vector<8xf32> to vector<8x1xf32>
    %183 = math.log %182 : vector<8x1xf32>
    %184 = vector.broadcast %183 : vector<8x1xf32> to vector<8x128xf32>
    %185 = arith.subf %179, %184 : vector<8x128xf32>
    %186 = arith.index_cast %c5_i32 : i32 to index
    %c0_131 = arith.constant 0 : index
    %c0_132 = arith.constant 0 : index
    %187 = vector.load %arg7[%186, %c0_131, %c0_132] : memref<8x8x128xf32, #tpu.memory_space<vmem>>, vector<1x8x128xf32>
    %188 = vector.shape_cast %187 : vector<1x8x128xf32> to vector<8x128xf32>
    %189 = vector.shape_cast %185 : vector<8x128xf32> to vector<1x8x128xf32>
    tpu.vector_store %arg7[%186, %c0_131, %c0_132], %189 {strides = array<i32>} : memref<8x8x128xf32, #tpu.memory_space<vmem>>, vector<1x8x128xf32>,
    %c6_i32 = arith.constant 6 : i32
    %190 = arith.index_cast %c6_i32 : i32 to index
    %c0_133 = arith.constant 0 : index
    %c0_134 = arith.constant 0 : index
    %191 = vector.load %arg1[%190, %c0_133, %c0_134] : memref<8x8x128xf32, #tpu.memory_space<vmem>>, vector<1x8x128xf32>
    %192 = vector.shape_cast %191 : vector<1x8x128xf32> to vector<8x128xf32>
    %c0_135 = arith.constant 0 : index
    %c0_136 = arith.constant 0 : index
    %193 = vector.load %arg9[%c0_135, %c0_136] : memref<8x256xf32, #tpu.memory_space<vmem>>, vector<8x128xf32>
    tpu.vector_store %arg9[%c0_135, %c0_136], %192 {strides = array<i32>} : memref<8x256xf32, #tpu.memory_space<vmem>>, vector<8x128xf32>,
    %c0_137 = arith.constant 0 : index
    %c128_138 = arith.constant 128 : index
    %194 = vector.load %arg9[%c0_137, %c128_138] : memref<8x256xf32, #tpu.memory_space<vmem>>, vector<8x128xf32>
    tpu.vector_store %arg9[%c0_137, %c128_138], %170 {strides = array<i32>} : memref<8x256xf32, #tpu.memory_space<vmem>>, vector<8x128xf32>,
    %c0_139 = arith.constant 0 : index
    %c0_140 = arith.constant 0 : index
    %195 = vector.load %arg9[%c0_139, %c0_140] : memref<8x256xf32, #tpu.memory_space<vmem>>, vector<8x256xf32>
    %c0_141 = arith.constant 0 : index
    %c0_142 = arith.constant 0 : index
    %196 = vector.load %arg3[%c0_141, %c0_142] : memref<256x128xf32, #tpu.memory_space<vmem>>, vector<256x128xf32>
    %cst_143 = arith.constant dense<0.000000e+00> : vector<8x128xf32>
    %197 = tpu.matmul %195, %196, %cst_143 {dimension_numbers = #tpu.dot_dimension_numbers<[1], [0], [0], [1], [0, 0, 1, 1], [], []>} : vector<8x256xf32>, vector<256x128xf32>, vector<8x128xf32> -> vector<8x128xf32>
    %c0_144 = arith.constant 0 : index
    %c0_145 = arith.constant 0 : index
    %198 = vector.load %arg4[%c0_144, %c0_145] : memref<1x128xf32, #tpu.memory_space<vmem>>, vector<1x128xf32>
    %199 = vector.broadcast %198 : vector<1x128xf32> to vector<8x128xf32>
    %200 = arith.addf %197, %199 : vector<8x128xf32>
    %201 = math.tanh %200 : vector<8x128xf32>
    %c0_146 = arith.constant 0 : index
    %c0_147 = arith.constant 0 : index
    %202 = vector.load %arg5[%c0_146, %c0_147] : memref<128x128xf32, #tpu.memory_space<vmem>>, vector<128x128xf32>
    %cst_148 = arith.constant dense<0.000000e+00> : vector<8x128xf32>
    %203 = tpu.matmul %201, %202, %cst_148 {dimension_numbers = #tpu.dot_dimension_numbers<[1], [0], [0], [1], [0, 0, 1, 1], [], []>} : vector<8x128xf32>, vector<128x128xf32>, vector<8x128xf32> -> vector<8x128xf32>
    %c0_149 = arith.constant 0 : index
    %c0_150 = arith.constant 0 : index
    %204 = vector.load %arg6[%c0_149, %c0_150] : memref<1x128xf32, #tpu.memory_space<vmem>>, vector<1x128xf32>
    %205 = vector.broadcast %204 : vector<1x128xf32> to vector<8x128xf32>
    %206 = arith.addf %203, %205 : vector<8x128xf32>
    %cst_151 = arith.constant dense<0xFF800000> : vector<8xf32>
    %207 = vector.multi_reduction <maximumf>, %206, %cst_151 [1] : vector<8x128xf32> to vector<8xf32>
    %208 = vector.shape_cast %207 : vector<8xf32> to vector<8x1xf32>
    %209 = vector.broadcast %208 : vector<8x1xf32> to vector<8x128xf32>
    %210 = arith.subf %206, %209 : vector<8x128xf32>
    %211 = math.exp %210 : vector<8x128xf32>
    %cst_152 = arith.constant dense<0.000000e+00> : vector<8xf32>
    %212 = vector.multi_reduction <add>, %211, %cst_152 [1] : vector<8x128xf32> to vector<8xf32>
    %213 = vector.shape_cast %212 : vector<8xf32> to vector<8x1xf32>
    %214 = math.log %213 : vector<8x1xf32>
    %215 = vector.broadcast %214 : vector<8x1xf32> to vector<8x128xf32>
    %216 = arith.subf %210, %215 : vector<8x128xf32>
    %217 = arith.index_cast %c6_i32 : i32 to index
    %c0_153 = arith.constant 0 : index
    %c0_154 = arith.constant 0 : index
    %218 = vector.load %arg7[%217, %c0_153, %c0_154] : memref<8x8x128xf32, #tpu.memory_space<vmem>>, vector<1x8x128xf32>
    %219 = vector.shape_cast %218 : vector<1x8x128xf32> to vector<8x128xf32>
    %220 = vector.shape_cast %216 : vector<8x128xf32> to vector<1x8x128xf32>
    tpu.vector_store %arg7[%217, %c0_153, %c0_154], %220 {strides = array<i32>} : memref<8x8x128xf32, #tpu.memory_space<vmem>>, vector<1x8x128xf32>,
    %c7_i32 = arith.constant 7 : i32
    %221 = arith.index_cast %c7_i32 : i32 to index
    %c0_155 = arith.constant 0 : index
    %c0_156 = arith.constant 0 : index
    %222 = vector.load %arg1[%221, %c0_155, %c0_156] : memref<8x8x128xf32, #tpu.memory_space<vmem>>, vector<1x8x128xf32>
    %223 = vector.shape_cast %222 : vector<1x8x128xf32> to vector<8x128xf32>
    %c0_157 = arith.constant 0 : index
    %c0_158 = arith.constant 0 : index
    %224 = vector.load %arg9[%c0_157, %c0_158] : memref<8x256xf32, #tpu.memory_space<vmem>>, vector<8x128xf32>
    tpu.vector_store %arg9[%c0_157, %c0_158], %223 {strides = array<i32>} : memref<8x256xf32, #tpu.memory_space<vmem>>, vector<8x128xf32>,
    %c0_159 = arith.constant 0 : index
    %c128_160 = arith.constant 128 : index
    %225 = vector.load %arg9[%c0_159, %c128_160] : memref<8x256xf32, #tpu.memory_space<vmem>>, vector<8x128xf32>
    tpu.vector_store %arg9[%c0_159, %c128_160], %201 {strides = array<i32>} : memref<8x256xf32, #tpu.memory_space<vmem>>, vector<8x128xf32>,
    %c0_161 = arith.constant 0 : index
    %c0_162 = arith.constant 0 : index
    %226 = vector.load %arg9[%c0_161, %c0_162] : memref<8x256xf32, #tpu.memory_space<vmem>>, vector<8x256xf32>
    %c0_163 = arith.constant 0 : index
    %c0_164 = arith.constant 0 : index
    %227 = vector.load %arg3[%c0_163, %c0_164] : memref<256x128xf32, #tpu.memory_space<vmem>>, vector<256x128xf32>
    %cst_165 = arith.constant dense<0.000000e+00> : vector<8x128xf32>
    %228 = tpu.matmul %226, %227, %cst_165 {dimension_numbers = #tpu.dot_dimension_numbers<[1], [0], [0], [1], [0, 0, 1, 1], [], []>} : vector<8x256xf32>, vector<256x128xf32>, vector<8x128xf32> -> vector<8x128xf32>
    %c0_166 = arith.constant 0 : index
    %c0_167 = arith.constant 0 : index
    %229 = vector.load %arg4[%c0_166, %c0_167] : memref<1x128xf32, #tpu.memory_space<vmem>>, vector<1x128xf32>
    %230 = vector.broadcast %229 : vector<1x128xf32> to vector<8x128xf32>
    %231 = arith.addf %228, %230 : vector<8x128xf32>
    %232 = math.tanh %231 : vector<8x128xf32>
    %c0_168 = arith.constant 0 : index
    %c0_169 = arith.constant 0 : index
    %233 = vector.load %arg5[%c0_168, %c0_169] : memref<128x128xf32, #tpu.memory_space<vmem>>, vector<128x128xf32>
    %cst_170 = arith.constant dense<0.000000e+00> : vector<8x128xf32>
    %234 = tpu.matmul %232, %233, %cst_170 {dimension_numbers = #tpu.dot_dimension_numbers<[1], [0], [0], [1], [0, 0, 1, 1], [], []>} : vector<8x128xf32>, vector<128x128xf32>, vector<8x128xf32> -> vector<8x128xf32>
    %c0_171 = arith.constant 0 : index
    %c0_172 = arith.constant 0 : index
    %235 = vector.load %arg6[%c0_171, %c0_172] : memref<1x128xf32, #tpu.memory_space<vmem>>, vector<1x128xf32>
    %236 = vector.broadcast %235 : vector<1x128xf32> to vector<8x128xf32>
    %237 = arith.addf %234, %236 : vector<8x128xf32>
    %cst_173 = arith.constant dense<0xFF800000> : vector<8xf32>
    %238 = vector.multi_reduction <maximumf>, %237, %cst_173 [1] : vector<8x128xf32> to vector<8xf32>
    %239 = vector.shape_cast %238 : vector<8xf32> to vector<8x1xf32>
    %240 = vector.broadcast %239 : vector<8x1xf32> to vector<8x128xf32>
    %241 = arith.subf %237, %240 : vector<8x128xf32>
    %242 = math.exp %241 : vector<8x128xf32>
    %cst_174 = arith.constant dense<0.000000e+00> : vector<8xf32>
    %243 = vector.multi_reduction <add>, %242, %cst_174 [1] : vector<8x128xf32> to vector<8xf32>
    %244 = vector.shape_cast %243 : vector<8xf32> to vector<8x1xf32>
    %245 = math.log %244 : vector<8x1xf32>
    %246 = vector.broadcast %245 : vector<8x1xf32> to vector<8x128xf32>
    %247 = arith.subf %241, %246 : vector<8x128xf32>
    %248 = arith.index_cast %c7_i32 : i32 to index
    %c0_175 = arith.constant 0 : index
    %c0_176 = arith.constant 0 : index
    %249 = vector.load %arg7[%248, %c0_175, %c0_176] : memref<8x8x128xf32, #tpu.memory_space<vmem>>, vector<1x8x128xf32>
    %250 = vector.shape_cast %249 : vector<1x8x128xf32> to vector<8x128xf32>
    %251 = vector.shape_cast %247 : vector<8x128xf32> to vector<1x8x128xf32>
    tpu.vector_store %arg7[%248, %c0_175, %c0_176], %251 {strides = array<i32>} : memref<8x8x128xf32, #tpu.memory_space<vmem>>, vector<1x8x128xf32>,
    %c8_i32 = arith.constant 8 : i32
    %c0_177 = arith.constant 0 : index
    %c0_178 = arith.constant 0 : index
    %252 = vector.load %arg10[%c0_177, %c0_178] : memref<8x128xf32, #tpu.memory_space<vmem>>, vector<8x128xf32>
    tpu.vector_store %arg10[%c0_177, %c0_178], %232 {strides = array<i32>} : memref<8x128xf32, #tpu.memory_space<vmem>>, vector<8x128xf32>,
    %c0_i32_179 = arith.constant 0 : i32
    %253 = arith.cmpi eq, %arg0, %c0_i32_179 : i32
    %254 = arith.extui %253 : i1 to i32
    %c0_i32_180 = arith.constant 0 : i32
    %255 = arith.cmpi ne, %254, %c0_i32_180 : i32
    scf.if %255 {
      %c0_181 = arith.constant 0 : index
      %c0_182 = arith.constant 0 : index
      %256 = vector.load %arg8[%c0_181, %c0_182] : memref<8x128xf32, #tpu.memory_space<vmem>>, vector<8x128xf32>
      tpu.vector_store %arg8[%c0_181, %c0_182], %232 {strides = array<i32>} : memref<8x128xf32, #tpu.memory_space<vmem>>, vector<8x128xf32>,
    } else {
    }
    return
  }
  func.func @transform_0(%arg0: i32) -> (i32, i32, i32) {
    %c0_i32 = arith.constant 0 : i32
    %c0_i32_0 = arith.constant 0 : i32
    %c0_i32_1 = arith.constant 0 : i32
    return %arg0, %c0_i32, %c0_i32_0 : i32, i32, i32
  }
  func.func @transform_1(%arg0: i32) -> (i32, i32) {
    %c0_i32 = arith.constant 0 : i32
    %c0_i32_0 = arith.constant 0 : i32
    %c0_i32_1 = arith.constant 0 : i32
    return %c0_i32, %c0_i32_0 : i32, i32
  }
  func.func @transform_2(%arg0: i32) -> (i32, i32) {
    %c0_i32 = arith.constant 0 : i32
    %c0_i32_0 = arith.constant 0 : i32
    %c0_i32_1 = arith.constant 0 : i32
    return %c0_i32, %c0_i32_0 : i32, i32
  }
  func.func @transform_3(%arg0: i32) -> (i32, i32) {
    %c0_i32 = arith.constant 0 : i32
    %c0_i32_0 = arith.constant 0 : i32
    %c0_i32_1 = arith.constant 0 : i32
    return %c0_i32, %c0_i32_0 : i32, i32
  }
  func.func @transform_4(%arg0: i32) -> (i32, i32) {
    %c0_i32 = arith.constant 0 : i32
    %c0_i32_0 = arith.constant 0 : i32
    %c0_i32_1 = arith.constant 0 : i32
    return %c0_i32, %c0_i32_0 : i32, i32
  }
  func.func @transform_5(%arg0: i32) -> (i32, i32) {
    %c0_i32 = arith.constant 0 : i32
    %c0_i32_0 = arith.constant 0 : i32
    %c0_i32_1 = arith.constant 0 : i32
    return %c0_i32, %c0_i32_0 : i32, i32
  }
  func.func @transform_6(%arg0: i32) -> (i32, i32, i32) {
    %c0_i32 = arith.constant 0 : i32
    %c0_i32_0 = arith.constant 0 : i32
    %c0_i32_1 = arith.constant 0 : i32
    return %arg0, %c0_i32, %c0_i32_0 : i32, i32, i32
  }
  func.func @transform_7(%arg0: i32) -> (i32, i32) {
    %c0_i32 = arith.constant 0 : i32
    %c0_i32_0 = arith.constant 0 : i32
    %c0_i32_1 = arith.constant 0 : i32
    return %c0_i32, %c0_i32_0 : i32, i32
  }
}

</mosaic_0001>

<bundles_post_ra>
// kernel: tpu_custom_call.1
= control target key start
LH: loop header
LB: loop body
LE: loop exit
PB: predicated region body
PF: predicated region fallthrough
CT: control target
= control target key end

     0   :  { %13 = vsyncpa [#allocation5], 0  ;;  %s3829_s0 = inlined_call_operand.hbm [shape: f32[8,8,128], index: 0, kind: input, shape index: {}]   ;;  %s3830_s1 = inlined_call_operand.hbm [shape: f32[8,128], index: 1, kind: input, shape index: {}]   ;;  %s3831_s2 = inlined_call_operand.hbm [shape: f32[256,128], index: 2, kind: input, shape index: {}]   ;;  %s3832_s3 = inlined_call_operand.vmem [shape: f32[1,128], index: 3, kind: input, shape index: {}]   ;;  %s3833_s4 = inlined_call_operand.hbm [shape: f32[128,128], index: 4, kind: input, shape index: {}]   ;;  %s3834_s5 = inlined_call_operand.vmem [shape: f32[1,128], index: 5, kind: input, shape index: {}]   ;;  %s3835_s6 = inlined_call_operand.hbm [shape: f32[8,8,128], index: 6, kind: output, shape index: {0}]   ;;  %s3836_s7 = inlined_call_operand.hbm [shape: f32[8,128], index: 7, kind: output, shape index: {1}]  }
   0x1   :  { %14 = vsyncpa [#allocation8], 0 }
   0x2   :  { %15 = vsyncpa [#allocation11], 0 }
   0x3   :  { %16 = vsyncpa [#allocation6], 0 }
   0x4   :  { %17 = vsyncpa [#allocation14], 0  ;;  %s3252_s24 = smov [#allocation7]   ;;  %s3253_s26 = smov [#allocation4]  }
   0x5   :  { %s36_s25 = sshll.u32 %s3252_s24, 4  ;;  %s23_s27 = sshll.u32 %s3253_s26, 4  ;;  %s37_s25 = int_to_ptr.vmem [resolvable:$true] %s36_s25  ;;  %s3303_s27 = int_to_ptr.vmem [resolvable:$true] %s23_s27 }
   0x6   :  { %s3110_s30 = scalar_lea.hbm %s3830_s1, 128 }
   0x7   :  { %p3111_p0 = scmp.ne.s32.totalorder %s3830_s1, %s3110_s30  ;;  %p3114_p1 = scmp.lt.u32.totalorder %s3110_s30, %s3830_s1 }
   0x9   :  { %p3116_p2 = pnand %p3114_p1, %p3111_p0 }
   0xb   :  { %3119 = shalt.err (!%p3116_p2)
}
   0xc   :  { %s3120_s12 = scalar_lea.vmem %s37_s25, 128  ;;  %p3125_p4 = scmp.lt.s32.totalorder %s37_s25, %s37_s25 }
   0xd   :  { %p3121_p3 = scmp.ne.s32.totalorder %s37_s25, %s3120_s12  ;;  %p3126_p5 = scmp.lt.s32.totalorder %s3120_s12, %s3120_s12 }
   0xf   :  { %p3127_p6 = por %p3126_p5, %p3125_p4 }
  0x11   :  { %p3128_p7 = pnand %p3127_p6, %p3121_p3 }
  0x13   :  { %3131 = shalt.err (!%p3128_p7)
}
  0x14   :  { %39 = dma.hbm_to_vmem [thread:$0]  %s3830_s1, 128, %s37_s25, [#allocation8]  }
  0x15   :  { %s3132_s17 = scalar_lea.hbm %s3829_s0, 1024 }
  0x16   :  { %p3133_p8 = scmp.ne.s32.totalorder %s3829_s0, %s3132_s17  ;;  %p3136_p9 = scmp.lt.u32.totalorder %s3132_s17, %s3829_s0 }
  0x18   :  { %p3138_p10 = pnand %p3136_p9, %p3133_p8 }
  0x1a   :  { %3141 = shalt.err (!%p3138_p10)
}
  0x1b   :  { %s3142_s22 = scalar_lea.vmem %s3303_s27, 1024  ;;  %p3147_p12 = scmp.lt.s32.totalorder %s3303_s27, %s3303_s27 }
  0x1c   :  { %p3143_p11 = scmp.ne.s32.totalorder %s3303_s27, %s3142_s22  ;;  %p3148_p13 = scmp.lt.s32.totalorder %s3142_s22, %s3142_s22 }
  0x1e   :  { %p3149_p0 = por %p3148_p13, %p3147_p12 }
  0x20   :  { %p3150_p1 = pnand %p3149_p0, %p3143_p11 }
  0x22   :  { %3153 = shalt.err (!%p3150_p1)
}
  0x23   :  { %s3254_s1 = smov 128   ;;  %s3255_s23 = smov 8  }
  0x24   :  { %29 = dma.hbm_to_vmem [thread:$0]  %s3829_s0, 1024, %s3303_s27, [#allocation5], %s3254_s1, %s3254_s1, %s3255_s23  }
  0x25   :  { %s3256_s26 = smov [#allocation9]   ;;  %s3257_s29 = smov [#allocation10]  }
  0x26   :  { %s45_s28 = sshll.u32 %s3256_s26, 4  ;;  %s59_s30 = sshll.u32 %s3257_s29, 4  ;;  %s46_s28 = int_to_ptr.vmem [resolvable:$true] %s45_s28  ;;  %s3337_s30 = int_to_ptr.vmem [resolvable:$true] %s59_s30 }
  0x27   :  { %s3154_s10 = scalar_lea.hbm %s3831_s2, 4096 }
  0x28   :  { %p3155_p2 = scmp.ne.s32.totalorder %s3831_s2, %s3154_s10  ;;  %p3158_p3 = scmp.lt.u32.totalorder %s3154_s10, %s3831_s2 }
  0x2a   :  { %p3160_p4 = pnand %p3158_p3, %p3155_p2 }
  0x2c   :  { %3163 = shalt.err (!%p3160_p4)
}
  0x2d   :  { %s3164_s0 = scalar_lea.vmem %s46_s28, 4096  ;;  %p3169_p6 = scmp.lt.s32.totalorder %s46_s28, %s46_s28 }
  0x2e   :  { %p3165_p5 = scmp.ne.s32.totalorder %s46_s28, %s3164_s0  ;;  %p3170_p7 = scmp.lt.s32.totalorder %s3164_s0, %s3164_s0 }
  0x30   :  { %p3171_p8 = por %p3170_p7, %p3169_p6 }
  0x32   :  { %p3172_p9 = pnand %p3171_p8, %p3165_p5 }
  0x34   :  { %3175 = shalt.err (!%p3172_p9)
}
  0x35   :  { %51 = dma.hbm_to_vmem [thread:$0]  %s3831_s2, 4096, %s46_s28, [#allocation8], %s3254_s1, %s3254_s1, %s3255_s23  }
  0x36   :  { %s3176_s18 = scalar_lea.hbm %s3833_s4, 2048 }
  0x37   :  { %p3177_p10 = scmp.ne.s32.totalorder %s3833_s4, %s3176_s18  ;;  %p3180_p11 = scmp.lt.u32.totalorder %s3176_s18, %s3833_s4 }
  0x39   :  { %p3182_p12 = pnand %p3180_p11, %p3177_p10 }
  0x3b   :  { %3185 = shalt.err (!%p3182_p12)
}
  0x3c   :  { %s3186_s24 = scalar_lea.vmem %s3337_s30, 2048  ;;  %p3191_p0 = scmp.lt.s32.totalorder %s3337_s30, %s3337_s30 }
  0x3d   :  { %p3187_p13 = scmp.ne.s32.totalorder %s3337_s30, %s3186_s24  ;;  %p3192_p1 = scmp.lt.s32.totalorder %s3186_s24, %s3186_s24 }
  0x3f   :  { %p3193_p2 = por %p3192_p1, %p3191_p0 }
  0x41   :  { %p3194_p3 = pnand %p3193_p2, %p3187_p13 }
  0x43   :  { %3197 = shalt.err (!%p3194_p3)
}
  0x44   :  { %65 = dma.hbm_to_vmem [thread:$0]  %s3833_s4, 2048, %s3337_s30, [#allocation11], %s3254_s1, %s3254_s1, %s3255_s23  }
  0x45   :  { %3242 = dma.done.wait [#allocation5], 1024  }
  0x46   :  { %3243 = vsyncadd [#allocation5], 4294966272 }
  0x47   :  { %3244 = dma.done.wait [#allocation8], 4224  }
  0x48   :  { %3245 = vsyncadd [#allocation8], 4294963072 }
  0x49   :  { %3246 = dma.done.wait [#allocation11], 2048  }
  0x4a   :  { %3247 = vsyncadd [#allocation11], 4294965248  ;;  %v3258_v0 = vmov 0.0|0.0   ;;  %v108_v1 = vld [vmem:[#allocation9 + $0x80] sm:$0xff]  ;;  %v109_v2 = vld [vmem:[#allocation9 + $0x88] sm:$0xff]  ;;  %vm3259_vm0 = vmmov 0  }
  0x4b   :  { %2635 = vmatprep.subr.bf16.mxu1 %v3258_v0  ;;  %v92_v3 = vld [vmem:[#allocation9] sm:$0xff]  ;;  %v3375_v4 = vpack.c.bf16 %v109_v2, %v108_v1  ;;  %v93_v5 = vld [vmem:[#allocation9 + $0x8] sm:$0xff]  ;;  %v110_v6 = vld [vmem:[#allocation9 + $0x90] sm:$0xff] }
  0x4c   :  { %v111_v7 = vld [vmem:[#allocation9 + $0x98] sm:$0xff]  ;;  %v3377_v8 = vpack.c.bf16 %v93_v5, %v92_v3  ;;  %v94_v10 = vld [vmem:[#allocation9 + $0x10] sm:$0xff]  ;;  %v112_v12 = vld [vmem:[#allocation9 + $0xa0] sm:$0xff] }
  0x4d   :  { %v3379_v9 = vpack.c.bf16 %v111_v7, %v110_v6  ;;  %v95_v11 = vld [vmem:[#allocation9 + $0x18] sm:$0xff]  ;;  %2604 = vmatprep.subr.bf16.mxu0 %v3375_v4  ;;  %v113_v13 = vld [vmem:[#allocation9 + $0xa8] sm:$0xff]  ;;  %v96_v16 = vld [vmem:[#allocation9 + $0x20] sm:$0xff] }
  0x4e   :  { %2606 = vmatpush3.bf16.msra.mxu0 %v3377_v8  ;;  %v3383_v14 = vpack.c.bf16 %v95_v11, %v94_v10  ;;  %v3386_v15 = vpack.c.bf16 %v113_v13, %v112_v12  ;;  %v97_v17 = vld [vmem:[#allocation9 + $0x28] sm:$0xff]  ;;  %v114_v18 = vld [vmem:[#allocation9 + $0xb0] sm:$0xff]  ;;  %v115_v19 = vld [vmem:[#allocation9 + $0xb8] sm:$0xff] }
  0x4f   :  { %2608 = vmatprep.subr.bf16.mxu0 %v3379_v9  ;;  %v3389_v20 = vpack.c.bf16 %v97_v17, %v96_v16  ;;  %v3392_v21 = vpack.c.bf16 %v115_v19, %v114_v18  ;;  %v98_v22 = vld [vmem:[#allocation9 + $0x30] sm:$0xff]  ;;  %v99_v23 = vld [vmem:[#allocation9 + $0x38] sm:$0xff]  ;;  %v116_v24 = vld [vmem:[#allocation9 + $0xc0] sm:$0xff]  ;;  %v3260_v16 = vmov 0.0  }
  0x50   :  { %v117_v25 = vld [vmem:[#allocation9 + $0xc8] sm:$0xff]  ;;  %v84_v26 = vld [vmem:[#allocation7] sm:$0xff]  ;;  %v202_v27 = vld [vmem:[#allocation10] sm:$0xff]  ;;  %v3395_v29 = vpack.c.bf16 %v99_v23, %v98_v22  ;;  %2355 = vmatprep.mubr.msk.f32.mxu1 %vm3259_vm0, %v3260_v16 }
  0x51   :  { %195 = vmatprep.mubr.f32.mxu0 %v84_v26  ;;  %v203_v28 = vld [vmem:[#allocation10 + $0x8] sm:$0xff]  ;;  %v204_v31 = vld [vmem:[#allocation10 + $0x10] sm:$0xff]  ;;  %v205_v32 = vld [vmem:[#allocation10 + $0x18] sm:$0xff]  ;;  %v3400_v33 = vpack.c.bf16 %v117_v25, %v116_v24 }
  0x52   :  { %2610 = vmatpush3.bf16.msra.mxu0 %v3383_v14  ;;  %v3397_v30 = vpack.c.bf16 %v203_v28, %v202_v27  ;;  %v100_v34 = vld [vmem:[#allocation9 + $0x40] sm:$0xff]  ;;  %v101_v35 = vld [vmem:[#allocation9 + $0x48] sm:$0xff]  ;;  %v118_v36 = vld [vmem:[#allocation9 + $0xd0] sm:$0xff]  ;;  %v3403_v38 = vpack.c.bf16 %v205_v32, %v204_v31 }
  0x53   :  { %2612 = vmatprep.subr.bf16.mxu0 %v3386_v15  ;;  %v119_v37 = vld [vmem:[#allocation9 + $0xd8] sm:$0xff]  ;;  %v206_v39 = vld [vmem:[#allocation10 + $0x20] sm:$0xff]  ;;  %v207_v40 = vld [vmem:[#allocation10 + $0x28] sm:$0xff]  ;;  %v3407_v41 = vpack.c.bf16 %v101_v35, %v100_v34 }
  0x54   :  { %2637 = vmatpush3.bf16.msra.mxu1 %v3397_v30  ;;  %v3410_v42 = vpack.c.bf16 %v119_v37, %v118_v36  ;;  %v102_v43 = vld [vmem:[#allocation9 + $0x50] sm:$0xff]  ;;  %v103_v44 = vld [vmem:[#allocation9 + $0x58] sm:$0xff]  ;;  %v120_v45 = vld [vmem:[#allocation9 + $0xe0] sm:$0xff]  ;;  %v3413_v47 = vpack.c.bf16 %v207_v40, %v206_v39 }
  0x55   :  { %2638 = vmatprep.subr.bf16.mxu1 %v3258_v0  ;;  %v121_v46 = vld [vmem:[#allocation9 + $0xe8] sm:$0xff]  ;;  %v208_v48 = vld [vmem:[#allocation10 + $0x30] sm:$0xff]  ;;  %v209_v49 = vld [vmem:[#allocation10 + $0x38] sm:$0xff]  ;;  %v3417_v50 = vpack.c.bf16 %v103_v44, %v102_v43 }
  0x56   :  { %2614 = vmatpush3.bf16.msra.mxu0 %v3389_v20  ;;  %v3420_v51 = vpack.c.bf16 %v121_v46, %v120_v45  ;;  %v104_v52 = vld [vmem:[#allocation9 + $0x60] sm:$0xff]  ;;  %v105_v53 = vld [vmem:[#allocation9 + $0x68] sm:$0xff]  ;;  %v122_v54 = vld [vmem:[#allocation9 + $0xf0] sm:$0xff]  ;;  %v3423_v56 = vpack.c.bf16 %v209_v49, %v208_v48 }
  0x57   :  { %2616 = vmatprep.subr.bf16.mxu0 %v3392_v21  ;;  %v123_v55 = vld [vmem:[#allocation9 + $0xf8] sm:$0xff]  ;;  %v3427_v57 = vpack.c.bf16 %v105_v53, %v104_v52  ;;  %v106_v59 = vld [vmem:[#allocation9 + $0x70] sm:$0xff]  ;;  %v210_v63 = vld [vmem:[#allocation10 + $0x40] sm:$0xff] }
  0x58   :  { %2640 = vmatpush3.bf16.msra.mxu1 %v3403_v38  ;;  %v3430_v58 = vpack.c.bf16 %v123_v55, %v122_v54  ;;  %v107_v60 = vld [vmem:[#allocation9 + $0x78] sm:$0xff]  ;;  %v211_v1 = vld [vmem:[#allocation10 + $0x48] sm:$0xff]  ;;  %v212_v3 = vld [vmem:[#allocation10 + $0x50] sm:$0xff] }
  0x59   :  { %2641 = vmatprep.subr.bf16.mxu1 %v3258_v0  ;;  %v3435_v61 = vpack.c.bf16 %v107_v60, %v106_v59  ;;  %v87_v62 = vld [vmem:[#allocation4] sm:$0xff]  ;;  %v3456_v2 = vpack.c.bf16 %v211_v1, %v210_v63  ;;  %v214_v7 = vld [vmem:[#allocation10 + $0x60] sm:$0xff]  ;;  %v215_v10 = vld [vmem:[#allocation10 + $0x68] sm:$0xff] }
  0x5a   :  { %2618 = vmatpush3.bf16.msra.mxu0 %v3395_v29  ;;  %v213_v5 = vld [vmem:[#allocation10 + $0x58] sm:$0xff]  ;;  %v3464_v11 = vpack.c.bf16 %v215_v10, %v214_v7  ;;  %v216_v12 = vld [vmem:[#allocation10 + $0x70] sm:$0xff]  ;;  %v307_v25 = vld [vmem:[#allocation4 + $0x8] sm:$0xff] }
  0x5b   :  { %2620 = vmatprep.subr.bf16.mxu0 %v3400_v33  ;;  %v3460_v6 = vpack.c.bf16 %v213_v5, %v212_v3  ;;  %v217_v13 = vld [vmem:[#allocation10 + $0x78] sm:$0xff]  ;;  %v528_v39 = vld [vmem:[#allocation4 + $0x10] sm:$0xff]  ;;  %v749_v53 = vld [vmem:[#allocation4 + $0x18] sm:$0xff] }
  0x5c   :  { %2643 = vmatpush3.bf16.msra.mxu1 %v3413_v47  ;;  %v3469_v17 = vpack.c.bf16 %v217_v13, %v216_v12  ;;  %v3477_v19 = vld [vmem:[%s3832_s3] ss:$0 sm:$0xff]  ;;  %v1197_v55 = vld [vmem:[#allocation9 + $0x8] sm:$0xff]  ;;  %v1200_v5 = vld [vmem:[#allocation9 + $0x20] sm:$0xff] }
  0x5d   :  { %2644 = vmatprep.subr.bf16.mxu1 %v3258_v0  ;;  %v3517_v27 = vld [vmem:[%s3834_s5] ss:$0 sm:$0xff]  ;;  %v1217_v63 = vld [vmem:[#allocation9 + $0xa8] sm:$0xff]  ;;  %v1218_v7 = vld [vmem:[#allocation9 + $0xb0] sm:$0xff] }
  0x5e   :  { %2622 = vmatpush3.bf16.msra.mxu0 %v3407_v41  ;;  %v1219_v10 = vld [vmem:[#allocation9 + $0xb8] sm:$0xff] }
  0x5f   :  { %2624 = vmatprep.subr.bf16.mxu0 %v3410_v42  ;;  %v3626_v13 = vpack.c.bf16 %v1219_v10, %v1218_v7  ;;  %v1315_v7 = vld [vmem:[#allocation10 + $0x48] sm:$0xff] }
  0x60   :  { %2646 = vmatpush3.bf16.msra.mxu1 %v3423_v56 }
  0x61   :  { %2647 = vmatprep.subr.bf16.mxu1 %v3258_v0 }
  0x62   :  { %2626 = vmatpush3.bf16.msra.mxu0 %v3417_v50 }
  0x63   :  { %2628 = vmatprep.subr.bf16.mxu0 %v3420_v51 }
  0x64   :  { %2649 = vmatpush3.bf16.msra.mxu1 %v3456_v2 }
  0x65   :  { %2650 = vmatprep.subr.bf16.mxu1 %v3258_v0 }
  0x66   :  { %2630 = vmatpush3.bf16.msra.mxu0 %v3427_v57 }
  0x67   :  { %2632 = vmatprep.subr.bf16.mxu0 %v3430_v58 }
  0x68   :  { %2652 = vmatpush3.bf16.msra.mxu1 %v3460_v6 }
  0x69   :  { %2653 = vmatprep.subr.bf16.mxu1 %v3258_v0 }
  0x6a   :  { %2634 = vmatpush3.bf16.msra.mxu0 %v3435_v61 }
  0x6b   :  { %2660 = vmatprep.subr.bf16.mxu0 %v3375_v4 }
  0x6c   :  { %2655 = vmatpush3.bf16.msra.mxu1 %v3464_v11 }
  0x6d   :  { %196 = vmatmul.mubr.f32.vlgmr.msra.gmra.mrb[0].mxu0 %v87_v62  ;;  %2656 = vmatprep.subr.bf16.mxu1 %v3258_v0  ;;  %v1216_v62 = vld [vmem:[#allocation9 + $0xa0] sm:$0xff] }
  0x6e   :  { %2662 = vmatpush3.bf16.msra.mxu0 %v3377_v8  ;;  %v3618_v3 = vpack.c.bf16 %v1217_v63, %v1216_v62  ;;  %v1312_v62 = vld [vmem:[#allocation10 + $0x30] sm:$0xff]  ;;  %v1313_v63 = vld [vmem:[#allocation10 + $0x38] sm:$0xff] }
  0x6f   :  { %2664 = vmatprep.subr.bf16.mxu0 %v3379_v9 }
  0x70   :  { %2658 = vmatpush3.bf16.msra.mxu1 %v3469_v17 }
  0x71   :  { %2691 = vmatprep.subr.bf16.mxu1 %v3258_v0 }
  0x72   :  { %2666 = vmatpush3.bf16.msra.mxu0 %v3383_v14 }
  0x73   :  { %2668 = vmatprep.subr.bf16.mxu0 %v3386_v15 }
  0x76   :  { %2670 = vmatpush3.bf16.msra.mxu0 %v3389_v20 }
  0x77   :  { %2672 = vmatprep.subr.bf16.mxu0 %v3392_v21 }
  0x7a   :  { %2674 = vmatpush3.bf16.msra.mxu0 %v3395_v29 }
  0x7b   :  { %2676 = vmatprep.subr.bf16.mxu0 %v3400_v33 }
  0x7e   :  { %2678 = vmatpush3.bf16.msra.mxu0 %v3407_v41 }
  0x7f   :  { %2680 = vmatprep.subr.bf16.mxu0 %v3410_v42 }
  0x82   :  { %2682 = vmatpush3.bf16.msra.mxu0 %v3417_v50 }
  0x83   :  { %2684 = vmatprep.subr.bf16.mxu0 %v3420_v51 }
  0x86   :  { %2686 = vmatpush3.bf16.msra.mxu0 %v3427_v57 }
  0x87   :  { %2688 = vmatprep.subr.bf16.mxu0 %v3430_v58 }
  0x8a   :  { %2690 = vmatpush3.bf16.msra.mxu0 %v3435_v61 }
  0x8b   :  { %2716 = vmatprep.subr.bf16.mxu0 %v3375_v4 }
 0x140   :  { %v1939_v18 = vpop.f32.mrb[0].mxu0 }
 0x141   :  { %v1940_v22 = vpop.f32.mrb[1].mxu0 }
 0x142   :  { %v1941_v23 = vadd.f32 %v1940_v22, %v1939_v18  ;;  %v1221_v22 = vld [vmem:[#allocation9 + $0xc8] sm:$0xff] }
 0x144   :  { %v198_v24 = vadd.f32 %v1941_v23, %v3477_v19 }
 0x146   :  { %3062 = vtanh.f32 %v198_v24  ;;  %v1205_v24 = vld [vmem:[#allocation9 + $0x48] sm:$0xff] }
 0x150   :  { %v3063_v26 = vpop.eup %3062 }
 0x151   :  { %2356 = vmatmul.mubr.f32.vlgmr.msra.gmra.mrb[0].mxu1 %v3063_v26  ;;  %415 = vmatprep.mubr.f32.mxu0 %v3063_v26 }
 0x152   :  { %416 = vmatmul.mubr.f32.vlgmr.msra.gmra.mrb[2].mxu0 %v307_v25  ;;  %2693 = vmatpush3.bf16.msra.mxu1 %v3397_v30 }
 0x153   :  { %2718 = vmatpush3.bf16.msra.mxu0 %v3377_v8  ;;  %2694 = vmatprep.subr.bf16.mxu1 %v3258_v0 }
 0x154   :  { %2720 = vmatprep.subr.bf16.mxu0 %v3379_v9  ;;  %2390 = vmatprep.mubr.msk.f32.mxu1 %vm3259_vm0, %v3260_v16 }
 0x156   :  { %2696 = vmatpush3.bf16.msra.mxu1 %v3403_v38 }
 0x157   :  { %2722 = vmatpush3.bf16.msra.mxu0 %v3383_v14  ;;  %2697 = vmatprep.subr.bf16.mxu1 %v3258_v0 }
 0x158   :  { %2724 = vmatprep.subr.bf16.mxu0 %v3386_v15 }
 0x15a   :  { %2699 = vmatpush3.bf16.msra.mxu1 %v3413_v47 }
 0x15b   :  { %2726 = vmatpush3.bf16.msra.mxu0 %v3389_v20  ;;  %2700 = vmatprep.subr.bf16.mxu1 %v3258_v0 }
 0x15c   :  { %2728 = vmatprep.subr.bf16.mxu0 %v3392_v21 }
 0x15e   :  { %2702 = vmatpush3.bf16.msra.mxu1 %v3423_v56 }
 0x15f   :  { %2730 = vmatpush3.bf16.msra.mxu0 %v3395_v29  ;;  %2703 = vmatprep.subr.bf16.mxu1 %v3258_v0 }
 0x160   :  { %2732 = vmatprep.subr.bf16.mxu0 %v3400_v33 }
 0x162   :  { %2705 = vmatpush3.bf16.msra.mxu1 %v3456_v2 }
 0x163   :  { %2734 = vmatpush3.bf16.msra.mxu0 %v3407_v41  ;;  %2706 = vmatprep.subr.bf16.mxu1 %v3258_v0 }
 0x164   :  { %2736 = vmatprep.subr.bf16.mxu0 %v3410_v42 }
 0x166   :  { %2708 = vmatpush3.bf16.msra.mxu1 %v3460_v6 }
 0x167   :  { %2738 = vmatpush3.bf16.msra.mxu0 %v3417_v50  ;;  %2709 = vmatprep.subr.bf16.mxu1 %v3258_v0 }
 0x168   :  { %2740 = vmatprep.subr.bf16.mxu0 %v3420_v51 }
 0x16a   :  { %2711 = vmatpush3.bf16.msra.mxu1 %v3464_v11 }
 0x16b   :  { %2742 = vmatpush3.bf16.msra.mxu0 %v3427_v57  ;;  %2712 = vmatprep.subr.bf16.mxu1 %v3258_v0 }
 0x16c   :  { %2744 = vmatprep.subr.bf16.mxu0 %v3430_v58 }
 0x16e   :  { %2714 = vmatpush3.bf16.msra.mxu1 %v3469_v17 }
 0x16f   :  { %2746 = vmatpush3.bf16.msra.mxu0 %v3435_v61  ;;  %2747 = vmatprep.subr.bf16.mxu1 %v3258_v0 }
 0x170   :  { %2772 = vmatprep.subr.bf16.mxu0 %v3375_v4 }
 0x224   :  { %v291_v28 = vpop.f32.mrb[0].mxu1 }
 0x225   :  { %v3520_v31 = vadd.f32 %v3517_v27, %v291_v28  ;;  %v2357_v32 = vpop.f32.mrb[1].mxu1  ;;  %v1991_v34 = vpop.f32.mrb[2].mxu0  ;;  %v1206_v28 = vld [vmem:[#allocation9 + $0x50] sm:$0xff] }
 0x226   :  { %v1992_v35 = vpop.f32.mrb[3].mxu0  ;;  %v1207_v32 = vld [vmem:[#allocation9 + $0x58] sm:$0xff] }
 0x227   :  { %v1993_v36 = vadd.f32 %v1992_v35, %v1991_v34  ;;  %295 = vmax.xlane.f32.xlu0 %v3520_v31  ;;  %v3651_v34 = vpack.c.bf16 %v1207_v32, %v1206_v28  ;;  %v1224_v35 = vld [vmem:[#allocation9 + $0xe0] sm:$0xff] }
 0x229   :  { %v418_v37 = vadd.f32 %v1993_v36, %v3477_v19  ;;  %v1225_v36 = vld [vmem:[#allocation9 + $0xe8] sm:$0xff] }
 0x22b   :  { %3064 = vtanh.f32 %v418_v37  ;;  %v1208_v37 = vld [vmem:[#allocation9 + $0x60] sm:$0xff] }
 0x235   :  { %v3065_v40 = vpop.eup %3064 }
 0x236   :  { %2391 = vmatmul.mubr.f32.vlgmr.msra.gmra.mrb[2].mxu1 %v3065_v40  ;;  %636 = vmatprep.mubr.f32.mxu0 %v3065_v40  ;;  %v1209_v40 = vld [vmem:[#allocation9 + $0x68] sm:$0xff] }
 0x237   :  { %637 = vmatmul.mubr.f32.vlgmr.msra.gmra.mrb[4].mxu0 %v528_v39  ;;  %2749 = vmatpush3.bf16.msra.mxu1 %v3397_v30  ;;  %v3655_v39 = vpack.c.bf16 %v1225_v36, %v1224_v35 }
 0x238   :  { %2774 = vmatpush3.bf16.msra.mxu0 %v3377_v8  ;;  %2750 = vmatprep.subr.bf16.mxu1 %v3258_v0 }
 0x239   :  { %2776 = vmatprep.subr.bf16.mxu0 %v3379_v9  ;;  %2425 = vmatprep.mubr.msk.f32.mxu1 %vm3259_vm0, %v3260_v16 }
 0x23b   :  { %2752 = vmatpush3.bf16.msra.mxu1 %v3403_v38 }
 0x23c   :  { %2778 = vmatpush3.bf16.msra.mxu0 %v3383_v14  ;;  %2753 = vmatprep.subr.bf16.mxu1 %v3258_v0 }
 0x23d   :  { %2780 = vmatprep.subr.bf16.mxu0 %v3386_v15 }
 0x23f   :  { %2755 = vmatpush3.bf16.msra.mxu1 %v3413_v47 }
 0x240   :  { %2782 = vmatpush3.bf16.msra.mxu0 %v3389_v20  ;;  %2756 = vmatprep.subr.bf16.mxu1 %v3258_v0 }
 0x241   :  { %2784 = vmatprep.subr.bf16.mxu0 %v3392_v21 }
 0x243   :  { %2758 = vmatpush3.bf16.msra.mxu1 %v3423_v56 }
 0x244   :  { %2786 = vmatpush3.bf16.msra.mxu0 %v3395_v29  ;;  %2759 = vmatprep.subr.bf16.mxu1 %v3258_v0 }
 0x245   :  { %2788 = vmatprep.subr.bf16.mxu0 %v3400_v33 }
 0x247   :  { %2761 = vmatpush3.bf16.msra.mxu1 %v3456_v2 }
 0x248   :  { %2790 = vmatpush3.bf16.msra.mxu0 %v3407_v41  ;;  %2762 = vmatprep.subr.bf16.mxu1 %v3258_v0 }
 0x249   :  { %2792 = vmatprep.subr.bf16.mxu0 %v3410_v42 }
 0x24b   :  { %2764 = vmatpush3.bf16.msra.mxu1 %v3460_v6 }
 0x24c   :  { %2794 = vmatpush3.bf16.msra.mxu0 %v3417_v50  ;;  %2765 = vmatprep.subr.bf16.mxu1 %v3258_v0 }
 0x24d   :  { %2796 = vmatprep.subr.bf16.mxu0 %v3420_v51 }
 0x24f   :  { %2767 = vmatpush3.bf16.msra.mxu1 %v3464_v11 }
 0x250   :  { %2798 = vmatpush3.bf16.msra.mxu0 %v3427_v57  ;;  %2768 = vmatprep.subr.bf16.mxu1 %v3258_v0 }
 0x251   :  { %2800 = vmatprep.subr.bf16.mxu0 %v3430_v58 }
 0x253   :  { %2770 = vmatpush3.bf16.msra.mxu1 %v3469_v17 }
 0x254   :  { %2802 = vmatpush3.bf16.msra.mxu0 %v3435_v61  ;;  %2803 = vmatprep.subr.bf16.mxu1 %v3258_v0 }
 0x255   :  { %2828 = vmatprep.subr.bf16.mxu0 %v3375_v4 }
 0x309   :  { %v511_v43 = vpop.f32.mrb[2].mxu1 }
 0x30a   :  { %v3559_v44 = vadd.f32 %v3517_v27, %v511_v43  ;;  %v2392_v45 = vpop.f32.mrb[3].mxu1  ;;  %v2043_v46 = vpop.f32.mrb[4].mxu0  ;;  %v1226_v43 = vld [vmem:[#allocation9 + $0xf0] sm:$0xff] }
 0x30b   :  { %v2044_v48 = vpop.f32.mrb[5].mxu0  ;;  %v1227_v45 = vld [vmem:[#allocation9 + $0xf8] sm:$0xff] }
 0x30c   :  { %v2045_v49 = vadd.f32 %v2044_v48, %v2043_v46  ;;  %515 = vmax.xlane.f32.xlu0 %v3559_v44  ;;  %v3657_v46 = vpack.c.bf16 %v1209_v40, %v1208_v37  ;;  %v3659_v48 = vpack.c.bf16 %v1227_v45, %v1226_v43  ;;  %v3729_v37 = vld [vmem:[%s3832_s3] ss:$0 sm:$0xff] }
 0x30e   :  { %v639_v52 = vadd.f32 %v2045_v49, %v3477_v19  ;;  %v1210_v49 = vld [vmem:[#allocation9 + $0x70] sm:$0xff] }
 0x310   :  { %3066 = vtanh.f32 %v639_v52  ;;  %v1211_v52 = vld [vmem:[#allocation9 + $0x78] sm:$0xff] }
 0x31a   :  { %v3067_v54 = vpop.eup %3066 }
 0x31b   :  { %2426 = vmatmul.mubr.f32.vlgmr.msra.gmra.mrb[4].mxu1 %v3067_v54  ;;  %857 = vmatprep.mubr.f32.mxu0 %v3067_v54 }
 0x31c   :  { %858 = vmatmul.mubr.f32.vlgmr.msra.gmra.mrb[6].mxu0 %v749_v53  ;;  %2805 = vmatpush3.bf16.msra.mxu1 %v3397_v30  ;;  %v3663_v53 = vpack.c.bf16 %v1211_v52, %v1210_v49  ;;  %v1412_v49 = vld [vmem:[#allocation4 + $0x30] sm:$0xff] }
 0x31d   :  { %2830 = vmatpush3.bf16.msra.mxu0 %v3377_v8  ;;  %2806 = vmatprep.subr.bf16.mxu1 %v3258_v0 }
 0x31e   :  { %2832 = vmatprep.subr.bf16.mxu0 %v3379_v9  ;;  %2460 = vmatprep.mubr.msk.f32.mxu1 %vm3259_vm0, %v3260_v16 }
 0x320   :  { %2808 = vmatpush3.bf16.msra.mxu1 %v3403_v38 }
 0x321   :  { %2834 = vmatpush3.bf16.msra.mxu0 %v3383_v14  ;;  %2809 = vmatprep.subr.bf16.mxu1 %v3258_v0 }
 0x322   :  { %2836 = vmatprep.subr.bf16.mxu0 %v3386_v15 }
 0x324   :  { %2811 = vmatpush3.bf16.msra.mxu1 %v3413_v47 }
 0x325   :  { %2838 = vmatpush3.bf16.msra.mxu0 %v3389_v20  ;;  %2812 = vmatprep.subr.bf16.mxu1 %v3258_v0 }
 0x326   :  { %2840 = vmatprep.subr.bf16.mxu0 %v3392_v21 }
 0x328   :  { %2814 = vmatpush3.bf16.msra.mxu1 %v3423_v56 }
 0x329   :  { %2842 = vmatpush3.bf16.msra.mxu0 %v3395_v29  ;;  %2815 = vmatprep.subr.bf16.mxu1 %v3258_v0  ;;  %v970_v29 = vld [vmem:[#allocation4 + $0x20] sm:$0xff] }
 0x32a   :  { %2844 = vmatprep.subr.bf16.mxu0 %v3400_v33 }
 0x32c   :  { %2817 = vmatpush3.bf16.msra.mxu1 %v3456_v2 }
 0x32d   :  { %2846 = vmatpush3.bf16.msra.mxu0 %v3407_v41  ;;  %2818 = vmatprep.subr.bf16.mxu1 %v3258_v0  ;;  %v1212_v41 = vld [vmem:[#allocation9 + $0x80] sm:$0xff] }
 0x32e   :  { %2848 = vmatprep.subr.bf16.mxu0 %v3410_v42  ;;  %v1213_v42 = vld [vmem:[#allocation9 + $0x88] sm:$0xff] }
 0x330   :  { %2820 = vmatpush3.bf16.msra.mxu1 %v3460_v6 }
 0x331   :  { %2850 = vmatpush3.bf16.msra.mxu0 %v3417_v50  ;;  %2821 = vmatprep.subr.bf16.mxu1 %v3258_v0  ;;  %v1196_v50 = vld [vmem:[#allocation9] sm:$0xff] }
 0x332   :  { %2852 = vmatprep.subr.bf16.mxu0 %v3420_v51  ;;  %v3605_v51 = vpack.c.bf16 %v1213_v42, %v1212_v41  ;;  %v3607_v59 = vpack.c.bf16 %v1197_v55, %v1196_v50  ;;  %v1306_v41 = vld [vmem:[#allocation10] sm:$0xff]  ;;  %v1307_v42 = vld [vmem:[#allocation10 + $0x8] sm:$0xff]  ;;  %v1308_v50 = vld [vmem:[#allocation10 + $0x10] sm:$0xff] }
 0x333   :  { %v3677_v55 = vpack.c.bf16 %v1307_v42, %v1306_v41 }
 0x334   :  { %2823 = vmatpush3.bf16.msra.mxu1 %v3464_v11 }
 0x335   :  { %2854 = vmatpush3.bf16.msra.mxu0 %v3427_v57  ;;  %2824 = vmatprep.subr.bf16.mxu1 %v3258_v0  ;;  %v1214_v57 = vld [vmem:[#allocation9 + $0x90] sm:$0xff] }
 0x336   :  { %2856 = vmatprep.subr.bf16.mxu0 %v3430_v58  ;;  %v1215_v58 = vld [vmem:[#allocation9 + $0x98] sm:$0xff] }
 0x337   :  { %v3610_v60 = vpack.c.bf16 %v1215_v58, %v1214_v57  ;;  %v1309_v57 = vld [vmem:[#allocation10 + $0x18] sm:$0xff]  ;;  %v1310_v58 = vld [vmem:[#allocation10 + $0x20] sm:$0xff] }
 0x338   :  { %2826 = vmatpush3.bf16.msra.mxu1 %v3469_v17 }
 0x339   :  { %2858 = vmatpush3.bf16.msra.mxu0 %v3435_v61  ;;  %2859 = vmatprep.subr.bf16.mxu1 %v3258_v0  ;;  %v1199_v61 = vld [vmem:[#allocation9 + $0x18] sm:$0xff] }
 0x33a   :  { %2884 = vmatprep.subr.bf16.mxu0 %v3605_v51 }
 0x3ee   :  { %v732_v4 = vpop.f32.mrb[4].mxu1 }
 0x3ef   :  { %v3597_v8 = vadd.f32 %v3517_v27, %v732_v4  ;;  %v2427_v9 = vpop.f32.mrb[5].mxu1  ;;  %v2095_v14 = vpop.f32.mrb[6].mxu0 }
 0x3f0   :  { %v2096_v15 = vpop.f32.mrb[7].mxu0 }
 0x3f1   :  { %v2097_v20 = vadd.f32 %v2096_v15, %v2095_v14  ;;  %736 = vmax.xlane.f32.xlu1 %v3597_v8 }
 0x3f3   :  { %v860_v21 = vadd.f32 %v2097_v20, %v3477_v19 }
 0x3f5   :  { %3068 = vtanh.f32 %v860_v21 }
 0x3ff   :  { %v3069_v33 = vpop.eup %3068 }
 0x400   :  { %2461 = vmatmul.mubr.f32.vlgmr.msra.gmra.mrb[6].mxu1 %v3069_v33  ;;  %1078 = vmatprep.mubr.f32.mxu0 %v3069_v33 }
 0x401   :  { %1079 = vmatmul.mubr.f32.vlgmr.msra.gmra.mrb[8].mxu0 %v970_v29  ;;  %2861 = vmatpush3.bf16.msra.mxu1 %v3397_v30  ;;  %v1198_v30 = vld [vmem:[#allocation9 + $0x10] sm:$0xff]  ;;  %v1191_v29 = vld [vmem:[#allocation4 + $0x28] sm:$0xff] }
 0x402   :  { %2862 = vmatprep.subr.bf16.mxu1 %v3258_v0  ;;  %2495 = vmatprep.mubr.msk.f32.mxu1 %vm3259_vm0, %v3260_v16  ;;  %v3615_v1 = vpack.c.bf16 %v1199_v61, %v1198_v30  ;;  %v1311_v30 = vld [vmem:[#allocation10 + $0x28] sm:$0xff] }
 0x403   :  { %2886 = vmatpush3.bf16.msra.mxu0 %v3607_v59  ;;  %v3686_v61 = vpack.c.bf16 %v1311_v30, %v1310_v58 }
 0x404   :  { %2888 = vmatprep.subr.bf16.mxu0 %v3610_v60 }
 0x405   :  { %2864 = vmatpush3.bf16.msra.mxu1 %v3403_v38  ;;  %v1201_v38 = vld [vmem:[#allocation9 + $0x28] sm:$0xff] }
 0x406   :  { %2865 = vmatprep.subr.bf16.mxu1 %v3258_v0  ;;  %v3623_v12 = vpack.c.bf16 %v1201_v38, %v1200_v5  ;;  %v3692_v5 = vpack.c.bf16 %v1313_v63, %v1312_v62  ;;  %v1314_v38 = vld [vmem:[#allocation10 + $0x40] sm:$0xff] }
 0x407   :  { %2890 = vmatpush3.bf16.msra.mxu0 %v3615_v1  ;;  %v3707_v10 = vpack.c.bf16 %v1315_v7, %v1314_v38 }
 0x408   :  { %2892 = vmatprep.subr.bf16.mxu0 %v3618_v3 }
 0x409   :  { %2867 = vmatpush3.bf16.msra.mxu1 %v3413_v47  ;;  %v1202_v47 = vld [vmem:[#allocation9 + $0x30] sm:$0xff] }
 0x40a   :  { %2868 = vmatprep.subr.bf16.mxu1 %v3258_v0 }
 0x40b   :  { %2894 = vmatpush3.bf16.msra.mxu0 %v3623_v12 }
 0x40c   :  { %2896 = vmatprep.subr.bf16.mxu0 %v3626_v13 }
 0x40d   :  { %2870 = vmatpush3.bf16.msra.mxu1 %v3423_v56  ;;  %v1203_v56 = vld [vmem:[#allocation9 + $0x38] sm:$0xff] }
 0x40e   :  { %2871 = vmatprep.subr.bf16.mxu1 %v3258_v0  ;;  %v3640_v18 = vpack.c.bf16 %v1203_v56, %v1202_v47  ;;  %v1316_v47 = vld [vmem:[#allocation10 + $0x50] sm:$0xff]  ;;  %v1317_v56 = vld [vmem:[#allocation10 + $0x58] sm:$0xff] }
 0x410   :  { %2898 = vmatpush3.bf16.msra.mxu0 %v3640_v18 }
 0x411   :  { %2873 = vmatpush3.bf16.msra.mxu1 %v3456_v2  ;;  %v1220_v2 = vld [vmem:[#allocation9 + $0xc0] sm:$0xff] }
 0x412   :  { %2874 = vmatprep.subr.bf16.mxu1 %v3258_v0  ;;  %v3643_v23 = vpack.c.bf16 %v1221_v22, %v1220_v2  ;;  %v3711_v2 = vpack.c.bf16 %v1317_v56, %v1316_v47  ;;  %v1318_v22 = vld [vmem:[#allocation10 + $0x60] sm:$0xff] }
 0x414   :  { %2900 = vmatprep.subr.bf16.mxu0 %v3643_v23 }
 0x415   :  { %2876 = vmatpush3.bf16.msra.mxu1 %v3460_v6  ;;  %v1204_v6 = vld [vmem:[#allocation9 + $0x40] sm:$0xff] }
 0x416   :  { %2877 = vmatprep.subr.bf16.mxu1 %v3258_v0  ;;  %v3645_v25 = vpack.c.bf16 %v1205_v24, %v1204_v6  ;;  %v1319_v6 = vld [vmem:[#allocation10 + $0x68] sm:$0xff] }
 0x417   :  { %v3715_v24 = vpack.c.bf16 %v1319_v6, %v1318_v22 }
 0x418   :  { %2902 = vmatpush3.bf16.msra.mxu0 %v3645_v25 }
 0x419   :  { %2879 = vmatpush3.bf16.msra.mxu1 %v3464_v11  ;;  %v1222_v11 = vld [vmem:[#allocation9 + $0xd0] sm:$0xff] }
 0x41a   :  { %2880 = vmatprep.subr.bf16.mxu1 %v3258_v0 }
 0x41d   :  { %2882 = vmatpush3.bf16.msra.mxu1 %v3469_v17  ;;  %v1223_v17 = vld [vmem:[#allocation9 + $0xd8] sm:$0xff] }
 0x41e   :  { %2915 = vmatprep.subr.bf16.mxu1 %v3258_v0  ;;  %v3649_v26 = vpack.c.bf16 %v1223_v17, %v1222_v11  ;;  %v1321_v11 = vld [vmem:[#allocation10 + $0x78] sm:$0xff] }
 0x420   :  { %2904 = vmatprep.subr.bf16.mxu0 %v3649_v26 }
 0x421   :  { %2906 = vmatpush3.bf16.msra.mxu0 %v3651_v34 }
 0x422   :  { %2908 = vmatprep.subr.bf16.mxu0 %v3655_v39 }
 0x425   :  { %2910 = vmatpush3.bf16.msra.mxu0 %v3657_v46 }
 0x426   :  { %2912 = vmatprep.subr.bf16.mxu0 %v3659_v48 }
 0x429   :  { %2914 = vmatpush3.bf16.msra.mxu0 %v3663_v53 }
 0x42a   :  { %2940 = vmatprep.subr.bf16.mxu0 %v3605_v51 }
 0x4d3   :  { %v953_v54 = vpop.f32.mrb[6].mxu1 }
 0x4d4   :  { %v3669_v4 = vadd.f32 %v3517_v27, %v953_v54  ;;  %v2462_v9 = vpop.f32.mrb[7].mxu1  ;;  %v2147_v14 = vpop.f32.mrb[8].mxu0 }
 0x4d5   :  { %v2148_v15 = vpop.f32.mrb[9].mxu0 }
 0x4d6   :  { %v2149_v20 = vadd.f32 %v2148_v15, %v2147_v14  ;;  %957 = vmax.xlane.f32.xlu1 %v3669_v4 }
 0x4d8   :  { %v1081_v21 = vadd.f32 %v2149_v20, %v3477_v19  ;;  %v3680_v19 = vpack.c.bf16 %v1309_v57, %v1308_v50 }
 0x4da   :  { %3070 = vtanh.f32 %v1081_v21 }
 0x4e4   :  { %v3071_v33 = vpop.eup %3070 }
 0x4e5   :  { %2496 = vmatmul.mubr.f32.vlgmr.msra.gmra.mrb[8].mxu1 %v3071_v33  ;;  %1299 = vmatprep.mubr.f32.mxu0 %v3071_v33 }
 0x4e6   :  { %1300 = vmatmul.mubr.f32.vlgmr.msra.gmra.mrb[10].mxu0 %v1191_v29  ;;  %2530 = vmatprep.mubr.msk.f32.mxu1 %vm3259_vm0, %v3260_v16 }
 0x4e7   :  { %2942 = vmatpush3.bf16.msra.mxu0 %v3607_v59  ;;  %2917 = vmatpush3.bf16.msra.mxu1 %v3677_v55 }
 0x4e8   :  { %2944 = vmatprep.subr.bf16.mxu0 %v3610_v60  ;;  %2918 = vmatprep.subr.bf16.mxu1 %v3258_v0 }
 0x4eb   :  { %2946 = vmatpush3.bf16.msra.mxu0 %v3615_v1  ;;  %2920 = vmatpush3.bf16.msra.mxu1 %v3680_v19 }
 0x4ec   :  { %2948 = vmatprep.subr.bf16.mxu0 %v3618_v3  ;;  %2921 = vmatprep.subr.bf16.mxu1 %v3258_v0 }
 0x4ef   :  { %2950 = vmatpush3.bf16.msra.mxu0 %v3623_v12  ;;  %2923 = vmatpush3.bf16.msra.mxu1 %v3686_v61 }
 0x4f0   :  { %2952 = vmatprep.subr.bf16.mxu0 %v3626_v13  ;;  %2924 = vmatprep.subr.bf16.mxu1 %v3258_v0 }
 0x4f3   :  { %2954 = vmatpush3.bf16.msra.mxu0 %v3640_v18  ;;  %2926 = vmatpush3.bf16.msra.mxu1 %v3692_v5 }
 0x4f4   :  { %2956 = vmatprep.subr.bf16.mxu0 %v3643_v23  ;;  %2927 = vmatprep.subr.bf16.mxu1 %v3258_v0 }
 0x4f7   :  { %2958 = vmatpush3.bf16.msra.mxu0 %v3645_v25  ;;  %2929 = vmatpush3.bf16.msra.mxu1 %v3707_v10 }
 0x4f8   :  { %2960 = vmatprep.subr.bf16.mxu0 %v3649_v26  ;;  %2930 = vmatprep.subr.bf16.mxu1 %v3258_v0 }
 0x4fb   :  { %2962 = vmatpush3.bf16.msra.mxu0 %v3651_v34  ;;  %2932 = vmatpush3.bf16.msra.mxu1 %v3711_v2 }
 0x4fc   :  { %2964 = vmatprep.subr.bf16.mxu0 %v3655_v39  ;;  %2933 = vmatprep.subr.bf16.mxu1 %v3258_v0 }
 0x4ff   :  { %2966 = vmatpush3.bf16.msra.mxu0 %v3657_v46  ;;  %2935 = vmatpush3.bf16.msra.mxu1 %v3715_v24 }
 0x500   :  { %2968 = vmatprep.subr.bf16.mxu0 %v3659_v48  ;;  %2936 = vmatprep.subr.bf16.mxu1 %v3258_v0 }
 0x503   :  { %2970 = vmatpush3.bf16.msra.mxu0 %v3663_v53 }
 0x504   :  { %2996 = vmatprep.subr.bf16.mxu0 %v3605_v51  ;;  %v1320_v51 = vld [vmem:[#allocation10 + $0x70] sm:$0xff] }
 0x505   :  { %v3718_v17 = vpack.c.bf16 %v1321_v11, %v1320_v51 }
 0x507   :  { %2938 = vmatpush3.bf16.msra.mxu1 %v3718_v17 }
 0x508   :  { %2971 = vmatprep.subr.bf16.mxu1 %v3258_v0 }
 0x5b8   :  { %v1174_v28 = vpop.f32.mrb[8].mxu1 }
 0x5b9   :  { %v3724_v32 = vadd.f32 %v3517_v27, %v1174_v28  ;;  %v2497_v35 = vpop.f32.mrb[9].mxu1  ;;  %v2199_v36 = vpop.f32.mrb[10].mxu0  ;;  %v3769_v27 = vld [vmem:[%s3834_s5] ss:$0 sm:$0xff]  ;;  %s3261_s5 = smov [#allocation13]  }
 0x5ba   :  { %v2200_v40 = vpop.f32.mrb[11].mxu0  ;;  %s1876_s10 = sshll.u32 %s3261_s5, 4  ;;  %s1877_s10 = int_to_ptr.vmem [resolvable:$true] %s1876_s10 }
 0x5bb   :  { %v2201_v43 = vadd.f32 %v2200_v40, %v2199_v36  ;;  %1178 = vmax.xlane.f32.xlu0 %v3724_v32  ;;  %s3198_s11 = scalar_lea.vmem %s1877_s10, 128  ;;  %p3203_p5 = scmp.lt.s32.totalorder %s1877_s10, %s1877_s10 }
 0x5bc   :  { %p3199_p4 = scmp.ne.s32.totalorder %s1877_s10, %s3198_s11  ;;  %p3204_p6 = scmp.lt.s32.totalorder %s3198_s11, %s3198_s11 }
 0x5bd   :  { %v1302_v45 = vadd.f32 %v2201_v43, %v3729_v37 }
 0x5be   :  { %p3205_p7 = por %p3204_p6, %p3203_p5 }
 0x5bf   :  { %3072 = vtanh.f32 %v1302_v45 }
 0x5c0   :  { %p3206_p8 = pnand %p3205_p7, %p3199_p4 }
 0x5c9   :  { %v3073_v52 = vpop.eup %3072 }
 0x5ca   :  { %2531 = vmatmul.mubr.f32.vlgmr.msra.gmra.mrb[10].mxu1 %v3073_v52  ;;  %1520 = vmatprep.mubr.f32.mxu0 %v3073_v52 }
 0x5cb   :  { %1521 = vmatmul.mubr.f32.vlgmr.msra.gmra.mrb[12].mxu0 %v1412_v49  ;;  %2973 = vmatpush3.bf16.msra.mxu1 %v3677_v55 }
 0x5cc   :  { %2998 = vmatpush3.bf16.msra.mxu0 %v3607_v59  ;;  %2974 = vmatprep.subr.bf16.mxu1 %v3258_v0 }
 0x5cd   :  { %3000 = vmatprep.subr.bf16.mxu0 %v3610_v60  ;;  %2565 = vmatprep.mubr.msk.f32.mxu1 %vm3259_vm0, %v3260_v16 }
 0x5cf   :  { %2976 = vmatpush3.bf16.msra.mxu1 %v3680_v19 }
 0x5d0   :  { %3002 = vmatpush3.bf16.msra.mxu0 %v3615_v1  ;;  %2977 = vmatprep.subr.bf16.mxu1 %v3258_v0 }
 0x5d1   :  { %3004 = vmatprep.subr.bf16.mxu0 %v3618_v3 }
 0x5d3   :  { %2979 = vmatpush3.bf16.msra.mxu1 %v3686_v61 }
 0x5d4   :  { %3006 = vmatpush3.bf16.msra.mxu0 %v3623_v12  ;;  %2980 = vmatprep.subr.bf16.mxu1 %v3258_v0 }
 0x5d5   :  { %3008 = vmatprep.subr.bf16.mxu0 %v3626_v13 }
 0x5d7   :  { %2982 = vmatpush3.bf16.msra.mxu1 %v3692_v5 }
 0x5d8   :  { %3010 = vmatpush3.bf16.msra.mxu0 %v3640_v18  ;;  %2983 = vmatprep.subr.bf16.mxu1 %v3258_v0 }
 0x5d9   :  { %3012 = vmatprep.subr.bf16.mxu0 %v3643_v23  ;;  %v1633_v23 = vld [vmem:[#allocation4 + $0x38] sm:$0xff] }
 0x5db   :  { %2985 = vmatpush3.bf16.msra.mxu1 %v3707_v10 }
 0x5dc   :  { %3014 = vmatpush3.bf16.msra.mxu0 %v3645_v25  ;;  %2986 = vmatprep.subr.bf16.mxu1 %v3258_v0 }
 0x5dd   :  { %3016 = vmatprep.subr.bf16.mxu0 %v3649_v26 }
 0x5df   :  { %2988 = vmatpush3.bf16.msra.mxu1 %v3711_v2 }
 0x5e0   :  { %3018 = vmatpush3.bf16.msra.mxu0 %v3651_v34  ;;  %2989 = vmatprep.subr.bf16.mxu1 %v3258_v0 }
 0x5e1   :  { %3020 = vmatprep.subr.bf16.mxu0 %v3655_v39  ;;  %v737_v39 = vpop.xlane.xlu1 %736 }
 0x5e3   :  { %2991 = vmatpush3.bf16.msra.mxu1 %v3715_v24 }
 0x5e4   :  { %3022 = vmatpush3.bf16.msra.mxu0 %v3657_v46  ;;  %2992 = vmatprep.subr.bf16.mxu1 %v3258_v0 }
 0x5e5   :  { %3024 = vmatprep.subr.bf16.mxu0 %v3659_v48  ;;  %v738_v48 = vsub.f32 %v3597_v8, %v737_v39 }
 0x5e7   :  { %2994 = vmatpush3.bf16.msra.mxu1 %v3718_v17  ;;  %v739_v54 = vmul.f32 1.442695, %v738_v48 }
 0x5e8   :  { %3026 = vmatpush3.bf16.msra.mxu0 %v3663_v53  ;;  %3027 = vmatprep.subr.bf16.mxu1 %v3258_v0 }
 0x69d   :  { %v1395_v59 = vpop.f32.mrb[10].mxu1 }
 0x69e   :  { %v3772_v60 = vadd.f32 %v3769_v27, %v1395_v59  ;;  %v2532_v1 = vpop.f32.mrb[11].mxu1  ;;  %v2251_v3 = vpop.f32.mrb[12].mxu0 }
 0x69f   :  { %v2252_v12 = vpop.f32.mrb[13].mxu0 }
 0x6a0   :  { %v2253_v13 = vadd.f32 %v2252_v12, %v2251_v3  ;;  %1399 = vmax.xlane.f32.xlu1 %v3772_v60 }
 0x6a2   :  { %v1523_v18 = vadd.f32 %v2253_v13, %v3729_v37 }
 0x6a4   :  { %3074 = vtanh.f32 %v1523_v18 }
 0x6ae   :  { %v3075_v25 = vpop.eup %3074 }
 0x6af   :  { %2566 = vmatmul.mubr.f32.vlgmr.msra.gmra.mrb[12].mxu1 %v3075_v25  ;;  %1741 = vmatprep.mubr.f32.mxu0 %v3075_v25 }
 0x6b0   :  { %1742 = vmatmul.mubr.f32.vlgmr.msra.gmra.mrb[14].mxu0 %v1633_v23  ;;  %3029 = vmatpush3.bf16.msra.mxu1 %v3677_v55 }
 0x6b1   :  { %3030 = vmatprep.subr.bf16.mxu1 %v3258_v0  ;;  %2600 = vmatprep.mubr.msk.f32.mxu1 %vm3259_vm0, %v3260_v16  ;;  %v296_v16 = vpop.xlane.xlu0 %295 }
 0x6b2   :  { %v297_v26 = vsub.f32 %v3520_v31, %v296_v16 }
 0x6b4   :  { %3032 = vmatpush3.bf16.msra.mxu1 %v3680_v19  ;;  %v298_v46 = vmul.f32 1.442695, %v297_v26 }
 0x6b5   :  { %3033 = vmatprep.subr.bf16.mxu1 %v3258_v0  ;;  %v516_v34 = vpop.xlane.xlu0 %515 }
 0x6b6   :  { %3076 = vpow2.f32 %v298_v46  ;;  %v517_v6 = vsub.f32 %v3559_v44, %v516_v34 }
 0x6b7   :  { %3078 = vpow2.f32 %v739_v54 }
 0x6b8   :  { %3035 = vmatpush3.bf16.msra.mxu1 %v3686_v61  ;;  %v518_v51 = vmul.f32 1.442695, %v517_v6 }
 0x6b9   :  { %3036 = vmatprep.subr.bf16.mxu1 %v3258_v0  ;;  %v1179_v53 = vpop.xlane.xlu0 %1178 }
 0x6ba   :  { %v1180_v9 = vsub.f32 %v3724_v32, %v1179_v53 }
 0x6bc   :  { %3038 = vmatpush3.bf16.msra.mxu1 %v3692_v5  ;;  %v1181_v14 = vmul.f32 1.442695, %v1180_v9 }
 0x6bd   :  { %3039 = vmatprep.subr.bf16.mxu1 %v3258_v0 }
 0x6be   :  { %3080 = vpow2.f32 %v1181_v14 }
 0x6c0   :  { %3041 = vmatpush3.bf16.msra.mxu1 %v3707_v10  ;;  %v3077_v41 = vpop.eup %3076 }
 0x6c1   :  { %3042 = vmatprep.subr.bf16.mxu1 %v3258_v0  ;;  %v3079_v8 = vpop.eup %3078 }
 0x6c4   :  { %3044 = vmatpush3.bf16.msra.mxu1 %v3711_v2 }
 0x6c5   :  { %3045 = vmatprep.subr.bf16.mxu1 %v3258_v0 }
 0x6c8   :  { %3047 = vmatpush3.bf16.msra.mxu1 %v3715_v24  ;;  %v3081_v42 = vpop.eup %3080  ;;  %v958_v24 = vpop.xlane.xlu1 %957 }
 0x6c9   :  { %3048 = vmatprep.subr.bf16.mxu1 %v3258_v0  ;;  %v959_v11 = vsub.f32 %v3669_v4, %v958_v24 }
 0x6cb   :  { %v960_v28 = vmul.f32 1.442695, %v959_v11 }
 0x6cc   :  { %3050 = vmatpush3.bf16.msra.mxu1 %v3718_v17 }
 0x72d   :  { %v1400_v17 = vpop.xlane.xlu1 %1399 }
 0x72e   :  { %v1401_v32 = vsub.f32 %v3772_v60, %v1400_v17 }
 0x730   :  { %v1402_v35 = vmul.f32 1.442695, %v1401_v32 }
 0x782   :  { %v1616_v15 = vpop.f32.mrb[12].mxu1 }
 0x783   :  { %v1617_v0 = vadd.f32 %v3769_v27, %v1616_v15  ;;  %v2567_v20 = vpop.f32.mrb[13].mxu1  ;;  %v2303_v21 = vpop.f32.mrb[14].mxu0 }
 0x784   :  { %v2304_v29 = vpop.f32.mrb[15].mxu0 }
 0x785   :  { %v2305_v33 = vadd.f32 %v2304_v29, %v2303_v21  ;;  %1620 = vmax.xlane.f32.xlu0 %v1617_v0 }
 0x787   :  { %v1744_v31 = vadd.f32 %v2305_v33, %v3729_v37 }
 0x789   :  { %3082 = vtanh.f32 %v1744_v31  ;;  %300 = vadd.xlane.f32.xlu0 %v3077_v41 }
 0x78d   :  { %741 = vadd.xlane.f32.xlu0 %v3079_v8 }
 0x791   :  { %1183 = vadd.xlane.f32.xlu0 %v3081_v42 }
 0x793   :  { %v3083_v50 = vpop.eup %3082 }
 0x794   :  { %1857 = vst [vmem:[#allocation13] sm:$0xff] %v3083_v50  ;;  %2601 = vmatmul.mubr.f32.vlgmr.msra.gmra.mrb[14].mxu1 %v3083_v50 }
 0x812   :  { %v1621_v55 = vpop.xlane.xlu0 %1620 }
 0x813   :  { %v1622_v57 = vsub.f32 %v1617_v0, %v1621_v55 }
 0x815   :  { %v1623_v19 = vmul.f32 1.442695, %v1622_v57 }
 0x816   :  { %v301_v58 = vpop.xlane.xlu0 %300 }
 0x817   :  { %3084 = vpow2.f32 %v1623_v19 }
 0x818   :  { %3086 = vlog2.f32 %v301_v58 }
 0x81a   :  { %v742_v30 = vpop.xlane.xlu0 %741 }
 0x81b   :  { %3088 = vlog2.f32 %v742_v30 }
 0x81e   :  { %v1184_v61 = vpop.xlane.xlu0 %1183 }
 0x81f   :  { %3090 = vlog2.f32 %v1184_v61 }
 0x820   :  { %3092 = vpow2.f32 %v518_v51 }
 0x821   :  { %v3085_v62 = vpop.eup %3084  ;;  %3094 = vpow2.f32 %v960_v28 }
 0x822   :  { %v3087_v63 = vpop.eup %3086  ;;  %1625 = vadd.xlane.f32.xlu0 %v3085_v62  ;;  %3096 = vpow2.f32 %v1402_v35 }
 0x823   :  { %v303_v5 = vmul.f32 0.6931472, %v3087_v63 }
 0x825   :  { %v3089_v38 = vpop.eup %3088  ;;  %v304_v7 = vsub.f32 %v297_v26, %v303_v5 }
 0x826   :  { %v744_v10 = vmul.f32 0.6931472, %v3089_v38 }
 0x827   :  { %305 = vst [vmem:[#allocation12] sm:$0xff] %v304_v7 }
 0x828   :  { %v745_v47 = vsub.f32 %v738_v48, %v744_v10 }
 0x829   :  { %v3091_v56 = vpop.eup %3090 }
 0x82a   :  { %747 = vst [vmem:[#allocation12 + $0x10] sm:$0xff] %v745_v47  ;;  %v1186_v2 = vmul.f32 0.6931472, %v3091_v56  ;;  %v3093_v43 = vpop.eup %3092 }
 0x82b   :  { %v3095_v44 = vpop.eup %3094 }
 0x82c   :  { %v1187_v22 = vsub.f32 %v1180_v9, %v1186_v2  ;;  %v3097_v45 = vpop.eup %3096 }
 0x82e   :  { %1189 = vst [vmem:[#allocation12 + $0x20] sm:$0xff] %v1187_v22 }
 0x867   :  { %v1837_v36 = vpop.f32.mrb[14].mxu1 }
 0x868   :  { %v1838_v37 = vadd.f32 %v3769_v27, %v1837_v36  ;;  %v2602_v40 = vpop.f32.mrb[15].mxu1 }
 0x86a   :  { %1841 = vmax.xlane.f32.xlu1 %v1838_v37 }
 0x86e   :  { %520 = vadd.xlane.f32.xlu1 %v3093_v43 }
 0x872   :  { %962 = vadd.xlane.f32.xlu1 %v3095_v44 }
 0x876   :  { %1404 = vadd.xlane.f32.xlu1 %v3097_v45 }
 0x8af   :  { %v1626_v4 = vpop.xlane.xlu0 %1625 }
 0x8b0   :  { %3098 = vlog2.f32 %v1626_v4 }
 0x8ba   :  { %v3099_v49 = vpop.eup %3098 }
 0x8bb   :  { %v1628_v52 = vmul.f32 0.6931472, %v3099_v49 }
 0x8bd   :  { %v1629_v59 = vsub.f32 %v1622_v57, %v1628_v52 }
 0x8bf   :  { %1631 = vst [vmem:[#allocation12 + $0x30] sm:$0xff] %v1629_v59 }
 0x8f7   :  { %v1842_v60 = vpop.xlane.xlu1 %1841 }
 0x8f8   :  { %v1843_v1 = vsub.f32 %v1838_v37, %v1842_v60 }
 0x8fa   :  { %v1844_v3 = vmul.f32 1.442695, %v1843_v1 }
 0x8fb   :  { %v521_v12 = vpop.xlane.xlu1 %520 }
 0x8fc   :  { %3100 = vpow2.f32 %v1844_v3 }
 0x8fd   :  { %3102 = vlog2.f32 %v521_v12 }
 0x8ff   :  { %v963_v27 = vpop.xlane.xlu1 %962 }
 0x900   :  { %3104 = vlog2.f32 %v963_v27 }
 0x903   :  { %v1405_v13 = vpop.xlane.xlu1 %1404 }
 0x904   :  { %3106 = vlog2.f32 %v1405_v13 }
 0x906   :  { %v3101_v18 = vpop.eup %3100 }
 0x907   :  { %v3103_v23 = vpop.eup %3102  ;;  %1846 = vadd.xlane.f32.xlu1 %v3101_v18 }
 0x908   :  { %v523_v25 = vmul.f32 0.6931472, %v3103_v23 }
 0x90a   :  { %v3105_v16 = vpop.eup %3104  ;;  %v524_v26 = vsub.f32 %v517_v6, %v523_v25 }
 0x90b   :  { %v965_v34 = vmul.f32 0.6931472, %v3105_v16 }
 0x90c   :  { %526 = vst [vmem:[#allocation12 + $0x8] sm:$0xff] %v524_v26 }
 0x90d   :  { %v966_v39 = vsub.f32 %v959_v11, %v965_v34 }
 0x90e   :  { %v3107_v46 = vpop.eup %3106 }
 0x90f   :  { %968 = vst [vmem:[#allocation12 + $0x18] sm:$0xff] %v966_v39  ;;  %v1407_v48 = vmul.f32 0.6931472, %v3107_v46 }
 0x911   :  { %v1408_v53 = vsub.f32 %v1401_v32, %v1407_v48 }
 0x913   :  { %1410 = vst [vmem:[#allocation12 + $0x28] sm:$0xff] %v1408_v53 }
 0x914   :  { %3209 = shalt.err (!%p3206_p8)
}
 0x915   :  { %s3210_s14 = scalar_lea.hbm %s3836_s7, 128 }
 0x916   :  { %p3211_p9 = scmp.ne.s32.totalorder %s3836_s7, %s3210_s14  ;;  %p3214_p10 = scmp.lt.u32.totalorder %s3210_s14, %s3836_s7 }
 0x918   :  { %p3216_p11 = pnand %p3214_p10, %p3211_p9 }
 0x91a   :  { %3219 = shalt.err (!%p3216_p11)
}
 0x91b   :  { %1879 = dma.vmem_to_hbm [thread:$0]  %s1877_s10, 128, %s3836_s7, [#allocation14]  }
 0x91c   :  { %s3262_s19 = smov [#allocation12]  }
 0x91d   :  { %s1863_s20 = sshll.u32 %s3262_s19, 4  ;;  %s1864_s20 = int_to_ptr.vmem [resolvable:$true] %s1863_s20 }
 0x91e   :  { %s3220_s21 = scalar_lea.vmem %s1864_s20, 1024  ;;  %p3225_p13 = scmp.lt.s32.totalorder %s1864_s20, %s1864_s20 }
 0x91f   :  { %p3221_p12 = scmp.ne.s32.totalorder %s1864_s20, %s3220_s21  ;;  %p3226_p0 = scmp.lt.s32.totalorder %s3220_s21, %s3220_s21 }
 0x921   :  { %p3227_p1 = por %p3226_p0, %p3225_p13 }
 0x923   :  { %p3228_p2 = pnand %p3227_p1, %p3221_p12 }
 0x994   :  { %v1847_v54 = vpop.xlane.xlu1 %1846 }
 0x995   :  { %3108 = vlog2.f32 %v1847_v54 }
 0x99f   :  { %v3109_v9 = vpop.eup %3108 }
 0x9a0   :  { %v1849_v14 = vmul.f32 0.6931472, %v3109_v9 }
 0x9a2   :  { %v1850_v15 = vsub.f32 %v1843_v1, %v1849_v14 }
 0x9a4   :  { %1852 = vst [vmem:[#allocation12 + $0x38] sm:$0xff] %v1850_v15 }
 0x9a5   :  { %3231 = shalt.err (!%p3228_p2)
}
 0x9a6   :  { %s3232_s7 = scalar_lea.hbm %s3835_s6, 1024 }
 0x9a7   :  { %p3233_p3 = scmp.ne.s32.totalorder %s3835_s6, %s3232_s7  ;;  %p3236_p4 = scmp.lt.u32.totalorder %s3232_s7, %s3835_s6 }
 0x9a9   :  { %p3238_p5 = pnand %p3236_p4, %p3233_p3 }
 0x9ab   :  { %3241 = shalt.err (!%p3238_p5)
}
 0x9ac   :  { %1869 = dma.vmem_to_hbm [thread:$0]  %s1864_s20, 1024, %s3835_s6, [#allocation6], %s3254_s1, %s3254_s1, %s3255_s23  }
 0x9ad   :  { %3248 = dma.done.wait [#allocation6], 1024  }
 0x9ae   :  { %3249 = vsyncadd [#allocation6], 4294966272 }
 0x9af   :  { %3250 = dma.done.wait [#allocation14], 128  }
 0x9b0   :  { %3251 = vsyncadd [#allocation14], 4294967168 }
 0x9b1   :  { %1886 = vsyncpa [#allocation5], 1 }
 0x9b2   :  { %1887 = vsyncpa [#allocation8], 1 }
 0x9b3   :  { %1888 = vsyncpa [#allocation11], 1 }
 0x9b4   :  { %1889 = vsyncpa [#allocation6], 1 }
 0x9b5   :  { %1890 = vsyncpa [#allocation14], 1 }

</bundles_post_ra>
